<compile_context>
chip_gen: v7x
topology: tpu7x:2x2x1
jax: 0.10.0
libtpu: 0.0.40
codegen_flags: <defaults>
</compile_context>

<pallas_src>
import jax
import jax.numpy as jnp
from jax import lax
from jax.experimental import pallas as pl
from jax.experimental.pallas import tpu as pltpu

# -------- small, module-consistent sizes (scaled down from E=100/H=128) --------
VOCAB = 50
EMBED_DIM = 32          # embedding_dim
HIDDEN = 32             # hidden_size
BN_EPS = 1e-5
HEAD_W = 128            # lane-padded width of the MLP head
B_PAD = 8               # batch padded to a full sublane group

PACKED_ORDER = [
    'embedding',
    'w_ih0', 'b_ih0', 'w_hh0',
    'w_ih1', 'b_ih1', 'w_hh1',
    'w_fc1', 'b_fc1', 'w_fc2', 'b_fc2', 'w_fc3', 'b_fc3',
]


# ============================ fused Pallas kernel ============================

def imdb_fused_kernel(ids_ref, emb_ref,
                      w_ih0_ref, b_ih0_ref, w_hh0_ref,
                      w_ih1_ref, b_ih1_ref, w_hh1_ref,
                      w1_ref, b1_ref, w2_ref, b2_ref, w3_ref, b3_ref,
                      out_ref, seq_ref):
    """Whole ImdbModel forward (eval mode) in one kernel.

    ids_ref : [T*Bp, 1] int32, time-major, batch padded to Bp=8 (row = t*Bp + b)
    emb_ref : [VOCAB, E]
    w_ih*   : gate-major interleaved [*, 8H]  columns = [i_f i_b | f_f f_b | g_f g_b | o_f o_b]
              (g columns pre-scaled by 2 for the single-sigmoid trick)
    w_hh*   : block-diagonal recurrent weights [2H, 8H] (rows 0:H act on h_f, H:2H on h_b)
    w1..w3  : MLP head, BN folded, fc1 rows permuted, lane-padded to 128
    out_ref : [Bp, 128] log-probs (valid lanes 0:2)
    """
    f32 = jnp.float32
    TB = ids_ref.shape[0]
    Bp = out_ref.shape[0]
    T = TB // Bp
    H = w_hh0_ref.shape[0] // 2
    V = emb_ref.shape[0]

    # ---- embedding via one-hot matmul (fused gather; MXU-friendly, exact) ----
    # note: any id outside [0, VOCAB) silently maps to a zero embedding.
    vocab_lane = lax.broadcasted_iota(jnp.int32, (TB, V), 1)
    onehot = jnp.where(ids_ref[...] == vocab_lane, 1.0, 0.0).astype(f32)        # [TB, V]
    x = jnp.dot(onehot, emb_ref[...], preferred_element_type=f32)               # [TB, E]

    # ---- hoisted layer-0 input projection, kept in registers ----
    xp0 = jnp.dot(x, w_ih0_ref[...], preferred_element_type=f32) + b_ih0_ref[...]  # [TB, 8H]

    # lane mask: fwd lanes are the first H of every 2H-wide gate block
    lane = lax.broadcasted_iota(jnp.int32, (Bp, 8 * H), 1)
    fwd_mask = (lane & (2 * H - 1)) < H

    def merged_cell(pre, h, c, w_hh):
        # one MXU op + one EUP pass on the serial chain
        g_all = pre + jnp.dot(h, w_hh, preferred_element_type=f32)              # [Bp, 8H]
        s = jax.nn.sigmoid(g_all)                    # g columns pre-scaled by 2 in pack_params
        i = s[:, 0:2 * H]
        f = s[:, 2 * H:4 * H]
        g = 2.0 * s[:, 4 * H:6 * H] - 1.0            # = tanh of the true preactivation
        o = s[:, 6 * H:8 * H]
        c_new = f * c + i * g                        # [Bp, 2H] = [c_f | c_b]
        h_new = o * jnp.tanh(c_new)                  # [Bp, 2H] = [h_f | h_b]
        return h_new, c_new

    zeros2 = jnp.zeros((Bp, 2 * H), f32)
    w_hh0 = w_hh0_ref[...]

    # ---- layer 0: fwd + bwd chains merged into one statically unrolled loop ----
    h, c = zeros2, zeros2
    for t in range(T):
        tb = T - 1 - t
        pre = jnp.where(fwd_mask,
                        xp0[t * Bp:(t + 1) * Bp, :],     # fwd gates use time t
                        xp0[tb * Bp:(tb + 1) * Bp, :])   # bwd gates use time T-1-t
        h, c = merged_cell(pre, h, c, w_hh0)
        seq_ref[t * Bp:(t + 1) * Bp, 0:H] = h[:, 0:H]          # fwd output of time t
        seq_ref[tb * Bp:(tb + 1) * Bp, H:2 * H] = h[:, H:2 * H]  # bwd output of time T-1-t

    # ---- hoisted layer-1 input projection (single matmul over the whole sequence) ----
    xp1 = jnp.dot(seq_ref[...], w_ih1_ref[...], preferred_element_type=f32) + b_ih1_ref[...]

    w_hh1 = w_hh1_ref[...]

    # ---- layer 1: merged fwd + bwd, unrolled ----
    h, c = zeros2, zeros2
    for t in range(T):
        tb = T - 1 - t
        pre = jnp.where(fwd_mask,
                        xp1[t * Bp:(t + 1) * Bp, :],
                        xp1[tb * Bp:(tb + 1) * Bp, :])
        h, c = merged_cell(pre, h, c, w_hh1)

    # final h = [h_f(T-1) | h_b(0)]; PyTorch feat order [h_b | h_f] is handled by the
    # row-permuted w_fc1 (no in-kernel concat).
    # ---- MLP head: fc1(+BN1 folded) -> ReLU -> fc2(+BN2 folded) -> ReLU -> fc3 -> log_softmax
    # (dropout_layer is identity in eval mode; padded logit lanes carry a -1e30 bias)
    z = jnp.maximum(jnp.dot(h, w1_ref[...], preferred_element_type=f32) + b1_ref[...], 0.0)
    z = jnp.maximum(jnp.dot(z, w2_ref[...], preferred_element_type=f32) + b2_ref[...], 0.0)
    logits = jnp.dot(z, w3_ref[...], preferred_element_type=f32) + b3_ref[...]
    shifted = logits - jnp.max(logits, axis=-1, keepdims=True)
    out_ref[...] = shifted - jnp.log(jnp.sum(jnp.exp(shifted), axis=-1, keepdims=True))


# ============================ weight packing (wrapper-side constant folding) ============================

def _interleave_gate_cols(wf, wb, H):
    """[*,4H] fwd + [*,4H] bwd (gate order i,f,g,o) -> [*,8H] gate-major interleaved."""
    blocks = []
    for g in range(4):
        blocks.append(wf[:, g * H:(g + 1) * H])
        blocks.append(wb[:, g * H:(g + 1) * H])
    return jnp.concatenate(blocks, axis=1)


def _gate_scale(H):
    # tanh(x) = 2*sigmoid(2x) - 1: pre-scale the g-gate columns by 2 so the kernel only
    # needs ONE sigmoid pass over the full gate tile.
    return jnp.ones((1, 8 * H), jnp.float32).at[:, 4 * H:6 * H].set(2.0)


def _pad(a, rows, cols, fill=0.0):
    out = jnp.full((rows, cols), fill, jnp.float32)
    return out.at[:a.shape[0], :a.shape[1]].set(a.astype(jnp.float32))


def pack_params(params):
    """One-time constant folding / weight packing outside the kernel."""
    H = HIDDEN
    gs = _gate_scale(H)
    s1 = params['bn1_gamma'] * lax.rsqrt(params['bn1_var'] + BN_EPS)
    s2 = params['bn2_gamma'] * lax.rsqrt(params['bn2_var'] + BN_EPS)

    # input-projection weights / biases, gate-major interleaved
    w_ih0 = _interleave_gate_cols(params['w_ih0f'], params['w_ih0b'], H) * gs   # [E, 8H]
    b_ih0 = _interleave_gate_cols(params['b0f'], params['b0b'], H) * gs         # [1, 8H]
    w_ih1 = _interleave_gate_cols(params['w_ih1f'], params['w_ih1b'], H) * gs   # [2H, 8H]
    b_ih1 = _interleave_gate_cols(params['b1f'], params['b1b'], H) * gs

    # block-diagonal recurrent weights: rows 0:H act on h_f (fwd columns only),
    # rows H:2H act on h_b (bwd columns only)
    zf = jnp.zeros_like(params['w_hh0f'])
    w_hh0 = jnp.concatenate([_interleave_gate_cols(params['w_hh0f'], zf, H),
                             _interleave_gate_cols(zf, params['w_hh0b'], H)], axis=0) * gs
    w_hh1 = jnp.concatenate([_interleave_gate_cols(params['w_hh1f'], zf, H),
                             _interleave_gate_cols(zf, params['w_hh1b'], H)], axis=0) * gs

    # head: permute fc1 rows so kernel feat [h_f | h_b] matches torch's cat([h_b, h_f]);
    # fold eval BatchNorm into fc1/fc2; zero-pad widths to 128 lanes.
    w_fc1 = jnp.concatenate([params['w_fc1'][H:2 * H], params['w_fc1'][0:H]], axis=0) * s1
    b_fc1 = (params['b_fc1'] - params['bn1_mean']) * s1 + params['bn1_beta']
    w_fc2 = params['w_fc2'] * s2
    b_fc2 = (params['b_fc2'] - params['bn2_mean']) * s2 + params['bn2_beta']

    return {
        'embedding': params['embedding'].astype(jnp.float32),
        'w_ih0': w_ih0, 'b_ih0': b_ih0, 'w_hh0': w_hh0,
        'w_ih1': w_ih1, 'b_ih1': b_ih1, 'w_hh1': w_hh1,
        'w_fc1': _pad(w_fc1, 2 * H, HEAD_W), 'b_fc1': _pad(b_fc1, 1, HEAD_W),
        'w_fc2': _pad(w_fc2, HEAD_W, HEAD_W), 'b_fc2': _pad(b_fc2, 1, HEAD_W),
        'w_fc3': _pad(params['w_fc3'], HEAD_W, HEAD_W),
        # padded logit lanes get a huge negative bias so they vanish in the log_softmax
        'b_fc3': _pad(params['b_fc3'], 1, HEAD_W, fill=-1e30),
    }


# ============================ wrapper ============================

def imdb_forward(token_ids, packed):
    """token_ids: int32 [B, T].  Returns log-probs [B, 2]."""
    B, T = token_ids.shape
    assert B <= B_PAD
    # time-major, batch padded to 8 sublanes (row = t*B_PAD + b); pad tokens use id 0
    ids_tm = jnp.zeros((T, B_PAD), jnp.int32).at[:, :B].set(token_ids.T.astype(jnp.int32))
    ids_tm = ids_tm.reshape(T * B_PAD, 1)

    vmem = pl.BlockSpec(memory_space=pltpu.MemorySpace.VMEM)
    args = [ids_tm] + [packed[k] for k in PACKED_ORDER]

    out = pl.pallas_call(
        imdb_fused_kernel,
        out_shape=jax.ShapeDtypeStruct((B_PAD, HEAD_W), jnp.float32),
        in_specs=[vmem] * len(args),
        out_specs=vmem,
        scratch_shapes=[pltpu.VMEM((T * B_PAD, 2 * HIDDEN), jnp.float32)],  # layer-0 outputs
    )(*args)
    return out[:B, :2]


# ============================ pure-JAX reference ============================

def reference_forward(token_ids, params):
    H = HIDDEN
    emb = jnp.take(params['embedding'], token_ids, axis=0).astype(jnp.float32)
    x = jnp.transpose(emb, (1, 0, 2))  # [T, B, E]

    def run_dir(seq, w_ih, w_hh, b, reverse):
        if reverse:
            seq = seq[::-1]

        def step(carry, xt):
            h, c = carry
            gates = xt @ w_ih + h @ w_hh + b
            i = jax.nn.sigmoid(gates[:, :H])
            f = jax.nn.sigmoid(gates[:, H:2 * H])
            g = jnp.tanh(gates[:, 2 * H:3 * H])
            o = jax.nn.sigmoid(gates[:, 3 * H:])
            c = f * c + i * g
            h = o * jnp.tanh(c)
            return (h, c), h

        Bsz = seq.shape[1]
        init = (jnp.zeros((Bsz, H), jnp.float32), jnp.zeros((Bsz, H), jnp.float32))
        (h, _), ys = lax.scan(step, init, seq)
        if reverse:
            ys = ys[::-1]
        return h, ys

    hf0, ysf0 = run_dir(x, params['w_ih0f'], params['w_hh0f'], params['b0f'], False)
    hb0, ysb0 = run_dir(x, params['w_ih0b'], params['w_hh0b'], params['b0b'], True)
    seq1 = jnp.concatenate([ysf0, ysb0], axis=-1)
    hf1, _ = run_dir(seq1, params['w_ih1f'], params['w_hh1f'], params['b1f'], False)
    hb1, _ = run_dir(seq1, params['w_ih1b'], params['w_hh1b'], params['b1b'], True)
    feat = jnp.concatenate([hb1, hf1], axis=-1)

    eps = BN_EPS
    h = feat @ params['w_fc1'] + params['b_fc1']
    h = (h - params['bn1_mean']) * lax.rsqrt(params['bn1_var'] + eps) * params['bn1_gamma'] + params['bn1_beta']
    h = jnp.maximum(h, 0.0)
    h = h @ params['w_fc2'] + params['b_fc2']
    h = (h - params['bn2_mean']) * lax.rsqrt(params['bn2_var'] + eps) * params['bn2_gamma'] + params['bn2_beta']
    h = jnp.maximum(h, 0.0)
    logits = h @ params['w_fc3'] + params['b_fc3']
    return jax.nn.log_softmax(logits, axis=-1)


# ============================ parameter init ============================

def init_params(key):
    H, E = HIDDEN, EMBED_DIM
    shapes = {
        'embedding': (VOCAB, E),
        'w_ih0f': (E, 4 * H), 'w_hh0f': (H, 4 * H), 'b0f': (1, 4 * H),
        'w_ih0b': (E, 4 * H), 'w_hh0b': (H, 4 * H), 'b0b': (1, 4 * H),
        'w_ih1f': (2 * H, 4 * H), 'w_hh1f': (H, 4 * H), 'b1f': (1, 4 * H),
        'w_ih1b': (2 * H, 4 * H), 'w_hh1b': (H, 4 * H), 'b1b': (1, 4 * H),
        'w_fc1': (2 * H, 64), 'b_fc1': (1, 64),
        'bn1_gamma': (1, 64), 'bn1_beta': (1, 64), 'bn1_mean': (1, 64), 'bn1_var': (1, 64),
        'w_fc2': (64, 32), 'b_fc2': (1, 32),
        'bn2_gamma': (1, 32), 'bn2_beta': (1, 32), 'bn2_mean': (1, 32), 'bn2_var': (1, 32),
        'w_fc3': (32, 2), 'b_fc3': (1, 2),
    }
    keys = jax.random.split(key, len(shapes))
    params = {}
    for (name, shape), k in zip(shapes.items(), keys):
        params[name] = jax.random.uniform(k, shape, jnp.float32, -1.0, 1.0) * 0.1
    # BatchNorm running variances must be positive
    params['bn1_var'] = jnp.abs(params['bn1_var']) + 0.5
    params['bn2_var'] = jnp.abs(params['bn2_var']) + 0.5
    return params


# ============================ main ============================

if __name__ == "__main__":
    # TODO(synk): training-mode dropout / BatchNorm statistic updates are not implemented
    # (eval-mode forward only, matching model.eval()).
    key = jax.random.PRNGKey(0)
    pkey, dkey = jax.random.split(key)
    params = init_params(pkey)
    packed = pack_params(params)

    B, T = 2, 8
    token_ids = jax.random.randint(dkey, (B, T), 0, VOCAB, dtype=jnp.int32)

    out = imdb_forward(token_ids, packed)
    out = jax.block_until_ready(out)

    ref = reference_forward(token_ids, params)
    assert out.shape == (B, 2), out.shape
    assert jnp.allclose(out, ref, atol=5e-4, rtol=5e-4), (out, ref)

    print("KERNEL_OK")
</pallas_src>

<mosaic_0001>
module attributes {stable_mosaic.version = 11 : i64} {
  func.func @imdb_fused_kernel(%arg0: memref<64x1xi32, #tpu.memory_space<vmem>>, %arg1: memref<50x32xf32, #tpu.memory_space<vmem>>, %arg2: memref<32x256xf32, #tpu.memory_space<vmem>>, %arg3: memref<1x256xf32, #tpu.memory_space<vmem>>, %arg4: memref<64x256xf32, #tpu.memory_space<vmem>>, %arg5: memref<64x256xf32, #tpu.memory_space<vmem>>, %arg6: memref<1x256xf32, #tpu.memory_space<vmem>>, %arg7: memref<64x256xf32, #tpu.memory_space<vmem>>, %arg8: memref<64x128xf32, #tpu.memory_space<vmem>>, %arg9: memref<1x128xf32, #tpu.memory_space<vmem>>, %arg10: memref<128x128xf32, #tpu.memory_space<vmem>>, %arg11: memref<1x128xf32, #tpu.memory_space<vmem>>, %arg12: memref<128x128xf32, #tpu.memory_space<vmem>>, %arg13: memref<1x128xf32, #tpu.memory_space<vmem>>, %arg14: memref<8x128xf32, #tpu.memory_space<vmem>>, %arg15: memref<64x64xf32, #tpu.memory_space<vmem>>) attributes {dimension_semantics = [], scalar_prefetch = 0 : i64, scratch_operands = 1 : i64, tpu.core_type = #tpu.core_type<tc>} {
    %0 = tpu.iota {dimensions = array<i32: 1>} : vector<64x50xi32>
    %c0 = arith.constant 0 : index
    %c0_0 = arith.constant 0 : index
    %1 = vector.load %arg0[%c0, %c0_0] : memref<64x1xi32, #tpu.memory_space<vmem>>, vector<64x1xi32>
    %2 = vector.broadcast %1 : vector<64x1xi32> to vector<64x50xi32>
    %3 = arith.cmpi eq, %2, %0 : vector<64x50xi32>
    %cst = arith.constant 1.000000e+00 : f32
    %cst_1 = arith.constant 0.000000e+00 : f32
    %4 = vector.broadcast %cst : f32 to vector<64x50xf32>
    %5 = vector.broadcast %cst_1 : f32 to vector<64x50xf32>
    %6 = arith.select %3, %4, %5 : vector<64x50xi1>, vector<64x50xf32>
    %c0_2 = arith.constant 0 : index
    %c0_3 = arith.constant 0 : index
    %7 = vector.load %arg1[%c0_2, %c0_3] : memref<50x32xf32, #tpu.memory_space<vmem>>, vector<50x32xf32>
    %cst_4 = arith.constant dense<0.000000e+00> : vector<64x32xf32>
    %8 = tpu.matmul %6, %7, %cst_4 {dimension_numbers = #tpu.dot_dimension_numbers<[1], [0], [0], [1], [0, 0, 1, 1], [], []>} : vector<64x50xf32>, vector<50x32xf32>, vector<64x32xf32> -> vector<64x32xf32>
    %c0_5 = arith.constant 0 : index
    %c0_6 = arith.constant 0 : index
    %9 = vector.load %arg2[%c0_5, %c0_6] : memref<32x256xf32, #tpu.memory_space<vmem>>, vector<32x256xf32>
    %cst_7 = arith.constant dense<0.000000e+00> : vector<64x256xf32>
    %10 = tpu.matmul %8, %9, %cst_7 {dimension_numbers = #tpu.dot_dimension_numbers<[1], [0], [0], [1], [0, 0, 1, 1], [], []>} : vector<64x32xf32>, vector<32x256xf32>, vector<64x256xf32> -> vector<64x256xf32>
    %c0_8 = arith.constant 0 : index
    %c0_9 = arith.constant 0 : index
    %11 = vector.load %arg3[%c0_8, %c0_9] : memref<1x256xf32, #tpu.memory_space<vmem>>, vector<1x256xf32>
    %12 = vector.broadcast %11 : vector<1x256xf32> to vector<64x256xf32>
    %13 = arith.addf %10, %12 : vector<64x256xf32>
    %14 = tpu.iota {dimensions = array<i32: 1>} : vector<8x256xi32>
    %c63_i32 = arith.constant 63 : i32
    %15 = vector.broadcast %c63_i32 : i32 to vector<8x256xi32>
    %16 = arith.andi %14, %15 : vector<8x256xi32>
    %c32_i32 = arith.constant 32 : i32
    %17 = vector.broadcast %c32_i32 : i32 to vector<8x256xi32>
    %18 = arith.cmpi slt, %16, %17 : vector<8x256xi32>
    %cst_10 = arith.constant 0.000000e+00 : f32
    %19 = vector.broadcast %cst_10 : f32 to vector<8x64xf32>
    %c0_11 = arith.constant 0 : index
    %c0_12 = arith.constant 0 : index
    %20 = vector.load %arg4[%c0_11, %c0_12] : memref<64x256xf32, #tpu.memory_space<vmem>>, vector<64x256xf32>
    %21 = vector.extract_strided_slice %13 {offsets = [0, 0], sizes = [8, 256], strides = [1, 1]} : vector<64x256xf32> to vector<8x256xf32>
    %22 = vector.extract_strided_slice %13 {offsets = [56, 0], sizes = [8, 256], strides = [1, 1]} : vector<64x256xf32> to vector<8x256xf32>
    %23 = arith.select %18, %21, %22 : vector<8x256xi1>, vector<8x256xf32>
    %cst_13 = arith.constant dense<0.000000e+00> : vector<8x256xf32>
    %24 = tpu.matmul %19, %20, %cst_13 {dimension_numbers = #tpu.dot_dimension_numbers<[1], [0], [0], [1], [0, 0, 1, 1], [], []>} : vector<8x64xf32>, vector<64x256xf32>, vector<8x256xf32> -> vector<8x256xf32>
    %25 = arith.addf %23, %24 : vector<8x256xf32>
    %26 = arith.negf %25 : vector<8x256xf32>
    %27 = math.exp %26 : vector<8x256xf32>
    %cst_14 = arith.constant 1.000000e+00 : f32
    %28 = vector.broadcast %cst_14 : f32 to vector<8x256xf32>
    %29 = arith.addf %28, %27 : vector<8x256xf32>
    %30 = arith.divf %28, %29 : vector<8x256xf32>
    %31 = vector.extract_strided_slice %30 {offsets = [0, 0], sizes = [8, 64], strides = [1, 1]} : vector<8x256xf32> to vector<8x64xf32>
    %32 = vector.extract_strided_slice %30 {offsets = [0, 64], sizes = [8, 64], strides = [1, 1]} : vector<8x256xf32> to vector<8x64xf32>
    %33 = vector.extract_strided_slice %30 {offsets = [0, 128], sizes = [8, 64], strides = [1, 1]} : vector<8x256xf32> to vector<8x64xf32>
    %cst_15 = arith.constant 2.000000e+00 : f32
    %34 = vector.broadcast %cst_15 : f32 to vector<8x64xf32>
    %35 = arith.mulf %34, %33 : vector<8x64xf32>
    %cst_16 = arith.constant 1.000000e+00 : f32
    %36 = vector.broadcast %cst_16 : f32 to vector<8x64xf32>
    %37 = arith.subf %35, %36 : vector<8x64xf32>
    %38 = vector.extract_strided_slice %30 {offsets = [0, 192], sizes = [8, 64], strides = [1, 1]} : vector<8x256xf32> to vector<8x64xf32>
    %39 = arith.mulf %32, %19 : vector<8x64xf32>
    %40 = arith.mulf %31, %37 : vector<8x64xf32>
    %41 = arith.addf %39, %40 : vector<8x64xf32>
    %42 = math.tanh %41 : vector<8x64xf32>
    %43 = arith.mulf %38, %42 : vector<8x64xf32>
    %44 = vector.extract_strided_slice %43 {offsets = [0, 0], sizes = [8, 32], strides = [1, 1]} : vector<8x64xf32> to vector<8x32xf32>
    %c0_17 = arith.constant 0 : index
    %c0_18 = arith.constant 0 : index
    %45 = vector.load %arg15[%c0_17, %c0_18] : memref<64x64xf32, #tpu.memory_space<vmem>>, vector<8x32xf32>
    tpu.vector_store %arg15[%c0_17, %c0_18], %44 {strides = array<i32>} : memref<64x64xf32, #tpu.memory_space<vmem>>, vector<8x32xf32>,
    %46 = vector.extract_strided_slice %43 {offsets = [0, 32], sizes = [8, 32], strides = [1, 1]} : vector<8x64xf32> to vector<8x32xf32>
    %c56 = arith.constant 56 : index
    %c32 = arith.constant 32 : index
    %47 = vector.load %arg15[%c56, %c32] : memref<64x64xf32, #tpu.memory_space<vmem>>, vector<8x32xf32>
    tpu.vector_store %arg15[%c56, %c32], %46 {strides = array<i32>} : memref<64x64xf32, #tpu.memory_space<vmem>>, vector<8x32xf32>,
    %48 = vector.extract_strided_slice %13 {offsets = [8, 0], sizes = [8, 256], strides = [1, 1]} : vector<64x256xf32> to vector<8x256xf32>
    %49 = vector.extract_strided_slice %13 {offsets = [48, 0], sizes = [8, 256], strides = [1, 1]} : vector<64x256xf32> to vector<8x256xf32>
    %50 = arith.select %18, %48, %49 : vector<8x256xi1>, vector<8x256xf32>
    %cst_19 = arith.constant dense<0.000000e+00> : vector<8x256xf32>
    %51 = tpu.matmul %43, %20, %cst_19 {dimension_numbers = #tpu.dot_dimension_numbers<[1], [0], [0], [1], [0, 0, 1, 1], [], []>} : vector<8x64xf32>, vector<64x256xf32>, vector<8x256xf32> -> vector<8x256xf32>
    %52 = arith.addf %50, %51 : vector<8x256xf32>
    %53 = arith.negf %52 : vector<8x256xf32>
    %54 = math.exp %53 : vector<8x256xf32>
    %cst_20 = arith.constant 1.000000e+00 : f32
    %55 = vector.broadcast %cst_20 : f32 to vector<8x256xf32>
    %56 = arith.addf %55, %54 : vector<8x256xf32>
    %57 = arith.divf %55, %56 : vector<8x256xf32>
    %58 = vector.extract_strided_slice %57 {offsets = [0, 0], sizes = [8, 64], strides = [1, 1]} : vector<8x256xf32> to vector<8x64xf32>
    %59 = vector.extract_strided_slice %57 {offsets = [0, 64], sizes = [8, 64], strides = [1, 1]} : vector<8x256xf32> to vector<8x64xf32>
    %60 = vector.extract_strided_slice %57 {offsets = [0, 128], sizes = [8, 64], strides = [1, 1]} : vector<8x256xf32> to vector<8x64xf32>
    %cst_21 = arith.constant 2.000000e+00 : f32
    %61 = vector.broadcast %cst_21 : f32 to vector<8x64xf32>
    %62 = arith.mulf %61, %60 : vector<8x64xf32>
    %cst_22 = arith.constant 1.000000e+00 : f32
    %63 = vector.broadcast %cst_22 : f32 to vector<8x64xf32>
    %64 = arith.subf %62, %63 : vector<8x64xf32>
    %65 = vector.extract_strided_slice %57 {offsets = [0, 192], sizes = [8, 64], strides = [1, 1]} : vector<8x256xf32> to vector<8x64xf32>
    %66 = arith.mulf %59, %41 : vector<8x64xf32>
    %67 = arith.mulf %58, %64 : vector<8x64xf32>
    %68 = arith.addf %66, %67 : vector<8x64xf32>
    %69 = math.tanh %68 : vector<8x64xf32>
    %70 = arith.mulf %65, %69 : vector<8x64xf32>
    %71 = vector.extract_strided_slice %70 {offsets = [0, 0], sizes = [8, 32], strides = [1, 1]} : vector<8x64xf32> to vector<8x32xf32>
    %c8 = arith.constant 8 : index
    %c0_23 = arith.constant 0 : index
    %72 = vector.load %arg15[%c8, %c0_23] : memref<64x64xf32, #tpu.memory_space<vmem>>, vector<8x32xf32>
    tpu.vector_store %arg15[%c8, %c0_23], %71 {strides = array<i32>} : memref<64x64xf32, #tpu.memory_space<vmem>>, vector<8x32xf32>,
    %73 = vector.extract_strided_slice %70 {offsets = [0, 32], sizes = [8, 32], strides = [1, 1]} : vector<8x64xf32> to vector<8x32xf32>
    %c48 = arith.constant 48 : index
    %c32_24 = arith.constant 32 : index
    %74 = vector.load %arg15[%c48, %c32_24] : memref<64x64xf32, #tpu.memory_space<vmem>>, vector<8x32xf32>
    tpu.vector_store %arg15[%c48, %c32_24], %73 {strides = array<i32>} : memref<64x64xf32, #tpu.memory_space<vmem>>, vector<8x32xf32>,
    %75 = vector.extract_strided_slice %13 {offsets = [16, 0], sizes = [8, 256], strides = [1, 1]} : vector<64x256xf32> to vector<8x256xf32>
    %76 = vector.extract_strided_slice %13 {offsets = [40, 0], sizes = [8, 256], strides = [1, 1]} : vector<64x256xf32> to vector<8x256xf32>
    %77 = arith.select %18, %75, %76 : vector<8x256xi1>, vector<8x256xf32>
    %cst_25 = arith.constant dense<0.000000e+00> : vector<8x256xf32>
    %78 = tpu.matmul %70, %20, %cst_25 {dimension_numbers = #tpu.dot_dimension_numbers<[1], [0], [0], [1], [0, 0, 1, 1], [], []>} : vector<8x64xf32>, vector<64x256xf32>, vector<8x256xf32> -> vector<8x256xf32>
    %79 = arith.addf %77, %78 : vector<8x256xf32>
    %80 = arith.negf %79 : vector<8x256xf32>
    %81 = math.exp %80 : vector<8x256xf32>
    %cst_26 = arith.constant 1.000000e+00 : f32
    %82 = vector.broadcast %cst_26 : f32 to vector<8x256xf32>
    %83 = arith.addf %82, %81 : vector<8x256xf32>
    %84 = arith.divf %82, %83 : vector<8x256xf32>
    %85 = vector.extract_strided_slice %84 {offsets = [0, 0], sizes = [8, 64], strides = [1, 1]} : vector<8x256xf32> to vector<8x64xf32>
    %86 = vector.extract_strided_slice %84 {offsets = [0, 64], sizes = [8, 64], strides = [1, 1]} : vector<8x256xf32> to vector<8x64xf32>
    %87 = vector.extract_strided_slice %84 {offsets = [0, 128], sizes = [8, 64], strides = [1, 1]} : vector<8x256xf32> to vector<8x64xf32>
    %cst_27 = arith.constant 2.000000e+00 : f32
    %88 = vector.broadcast %cst_27 : f32 to vector<8x64xf32>
    %89 = arith.mulf %88, %87 : vector<8x64xf32>
    %cst_28 = arith.constant 1.000000e+00 : f32
    %90 = vector.broadcast %cst_28 : f32 to vector<8x64xf32>
    %91 = arith.subf %89, %90 : vector<8x64xf32>
    %92 = vector.extract_strided_slice %84 {offsets = [0, 192], sizes = [8, 64], strides = [1, 1]} : vector<8x256xf32> to vector<8x64xf32>
    %93 = arith.mulf %86, %68 : vector<8x64xf32>
    %94 = arith.mulf %85, %91 : vector<8x64xf32>
    %95 = arith.addf %93, %94 : vector<8x64xf32>
    %96 = math.tanh %95 : vector<8x64xf32>
    %97 = arith.mulf %92, %96 : vector<8x64xf32>
    %98 = vector.extract_strided_slice %97 {offsets = [0, 0], sizes = [8, 32], strides = [1, 1]} : vector<8x64xf32> to vector<8x32xf32>
    %c16 = arith.constant 16 : index
    %c0_29 = arith.constant 0 : index
    %99 = vector.load %arg15[%c16, %c0_29] : memref<64x64xf32, #tpu.memory_space<vmem>>, vector<8x32xf32>
    tpu.vector_store %arg15[%c16, %c0_29], %98 {strides = array<i32>} : memref<64x64xf32, #tpu.memory_space<vmem>>, vector<8x32xf32>,
    %100 = vector.extract_strided_slice %97 {offsets = [0, 32], sizes = [8, 32], strides = [1, 1]} : vector<8x64xf32> to vector<8x32xf32>
    %c40 = arith.constant 40 : index
    %c32_30 = arith.constant 32 : index
    %101 = vector.load %arg15[%c40, %c32_30] : memref<64x64xf32, #tpu.memory_space<vmem>>, vector<8x32xf32>
    tpu.vector_store %arg15[%c40, %c32_30], %100 {strides = array<i32>} : memref<64x64xf32, #tpu.memory_space<vmem>>, vector<8x32xf32>,
    %102 = vector.extract_strided_slice %13 {offsets = [24, 0], sizes = [8, 256], strides = [1, 1]} : vector<64x256xf32> to vector<8x256xf32>
    %103 = vector.extract_strided_slice %13 {offsets = [32, 0], sizes = [8, 256], strides = [1, 1]} : vector<64x256xf32> to vector<8x256xf32>
    %104 = arith.select %18, %102, %103 : vector<8x256xi1>, vector<8x256xf32>
    %cst_31 = arith.constant dense<0.000000e+00> : vector<8x256xf32>
    %105 = tpu.matmul %97, %20, %cst_31 {dimension_numbers = #tpu.dot_dimension_numbers<[1], [0], [0], [1], [0, 0, 1, 1], [], []>} : vector<8x64xf32>, vector<64x256xf32>, vector<8x256xf32> -> vector<8x256xf32>
    %106 = arith.addf %104, %105 : vector<8x256xf32>
    %107 = arith.negf %106 : vector<8x256xf32>
    %108 = math.exp %107 : vector<8x256xf32>
    %cst_32 = arith.constant 1.000000e+00 : f32
    %109 = vector.broadcast %cst_32 : f32 to vector<8x256xf32>
    %110 = arith.addf %109, %108 : vector<8x256xf32>
    %111 = arith.divf %109, %110 : vector<8x256xf32>
    %112 = vector.extract_strided_slice %111 {offsets = [0, 0], sizes = [8, 64], strides = [1, 1]} : vector<8x256xf32> to vector<8x64xf32>
    %113 = vector.extract_strided_slice %111 {offsets = [0, 64], sizes = [8, 64], strides = [1, 1]} : vector<8x256xf32> to vector<8x64xf32>
    %114 = vector.extract_strided_slice %111 {offsets = [0, 128], sizes = [8, 64], strides = [1, 1]} : vector<8x256xf32> to vector<8x64xf32>
    %cst_33 = arith.constant 2.000000e+00 : f32
    %115 = vector.broadcast %cst_33 : f32 to vector<8x64xf32>
    %116 = arith.mulf %115, %114 : vector<8x64xf32>
    %cst_34 = arith.constant 1.000000e+00 : f32
    %117 = vector.broadcast %cst_34 : f32 to vector<8x64xf32>
    %118 = arith.subf %116, %117 : vector<8x64xf32>
    %119 = vector.extract_strided_slice %111 {offsets = [0, 192], sizes = [8, 64], strides = [1, 1]} : vector<8x256xf32> to vector<8x64xf32>
    %120 = arith.mulf %113, %95 : vector<8x64xf32>
    %121 = arith.mulf %112, %118 : vector<8x64xf32>
    %122 = arith.addf %120, %121 : vector<8x64xf32>
    %123 = math.tanh %122 : vector<8x64xf32>
    %124 = arith.mulf %119, %123 : vector<8x64xf32>
    %125 = vector.extract_strided_slice %124 {offsets = [0, 0], sizes = [8, 32], strides = [1, 1]} : vector<8x64xf32> to vector<8x32xf32>
    %c24 = arith.constant 24 : index
    %c0_35 = arith.constant 0 : index
    %126 = vector.load %arg15[%c24, %c0_35] : memref<64x64xf32, #tpu.memory_space<vmem>>, vector<8x32xf32>
    tpu.vector_store %arg15[%c24, %c0_35], %125 {strides = array<i32>} : memref<64x64xf32, #tpu.memory_space<vmem>>, vector<8x32xf32>,
    %127 = vector.extract_strided_slice %124 {offsets = [0, 32], sizes = [8, 32], strides = [1, 1]} : vector<8x64xf32> to vector<8x32xf32>
    %c32_36 = arith.constant 32 : index
    %c32_37 = arith.constant 32 : index
    %128 = vector.load %arg15[%c32_36, %c32_37] : memref<64x64xf32, #tpu.memory_space<vmem>>, vector<8x32xf32>
    tpu.vector_store %arg15[%c32_36, %c32_37], %127 {strides = array<i32>} : memref<64x64xf32, #tpu.memory_space<vmem>>, vector<8x32xf32>,
    %129 = vector.extract_strided_slice %13 {offsets = [32, 0], sizes = [8, 256], strides = [1, 1]} : vector<64x256xf32> to vector<8x256xf32>
    %130 = vector.extract_strided_slice %13 {offsets = [24, 0], sizes = [8, 256], strides = [1, 1]} : vector<64x256xf32> to vector<8x256xf32>
    %131 = arith.select %18, %129, %130 : vector<8x256xi1>, vector<8x256xf32>
    %cst_38 = arith.constant dense<0.000000e+00> : vector<8x256xf32>
    %132 = tpu.matmul %124, %20, %cst_38 {dimension_numbers = #tpu.dot_dimension_numbers<[1], [0], [0], [1], [0, 0, 1, 1], [], []>} : vector<8x64xf32>, vector<64x256xf32>, vector<8x256xf32> -> vector<8x256xf32>
    %133 = arith.addf %131, %132 : vector<8x256xf32>
    %134 = arith.negf %133 : vector<8x256xf32>
    %135 = math.exp %134 : vector<8x256xf32>
    %cst_39 = arith.constant 1.000000e+00 : f32
    %136 = vector.broadcast %cst_39 : f32 to vector<8x256xf32>
    %137 = arith.addf %136, %135 : vector<8x256xf32>
    %138 = arith.divf %136, %137 : vector<8x256xf32>
    %139 = vector.extract_strided_slice %138 {offsets = [0, 0], sizes = [8, 64], strides = [1, 1]} : vector<8x256xf32> to vector<8x64xf32>
    %140 = vector.extract_strided_slice %138 {offsets = [0, 64], sizes = [8, 64], strides = [1, 1]} : vector<8x256xf32> to vector<8x64xf32>
    %141 = vector.extract_strided_slice %138 {offsets = [0, 128], sizes = [8, 64], strides = [1, 1]} : vector<8x256xf32> to vector<8x64xf32>
    %cst_40 = arith.constant 2.000000e+00 : f32
    %142 = vector.broadcast %cst_40 : f32 to vector<8x64xf32>
    %143 = arith.mulf %142, %141 : vector<8x64xf32>
    %cst_41 = arith.constant 1.000000e+00 : f32
    %144 = vector.broadcast %cst_41 : f32 to vector<8x64xf32>
    %145 = arith.subf %143, %144 : vector<8x64xf32>
    %146 = vector.extract_strided_slice %138 {offsets = [0, 192], sizes = [8, 64], strides = [1, 1]} : vector<8x256xf32> to vector<8x64xf32>
    %147 = arith.mulf %140, %122 : vector<8x64xf32>
    %148 = arith.mulf %139, %145 : vector<8x64xf32>
    %149 = arith.addf %147, %148 : vector<8x64xf32>
    %150 = math.tanh %149 : vector<8x64xf32>
    %151 = arith.mulf %146, %150 : vector<8x64xf32>
    %152 = vector.extract_strided_slice %151 {offsets = [0, 0], sizes = [8, 32], strides = [1, 1]} : vector<8x64xf32> to vector<8x32xf32>
    %c32_42 = arith.constant 32 : index
    %c0_43 = arith.constant 0 : index
    %153 = vector.load %arg15[%c32_42, %c0_43] : memref<64x64xf32, #tpu.memory_space<vmem>>, vector<8x32xf32>
    tpu.vector_store %arg15[%c32_42, %c0_43], %152 {strides = array<i32>} : memref<64x64xf32, #tpu.memory_space<vmem>>, vector<8x32xf32>,
    %154 = vector.extract_strided_slice %151 {offsets = [0, 32], sizes = [8, 32], strides = [1, 1]} : vector<8x64xf32> to vector<8x32xf32>
    %c24_44 = arith.constant 24 : index
    %c32_45 = arith.constant 32 : index
    %155 = vector.load %arg15[%c24_44, %c32_45] : memref<64x64xf32, #tpu.memory_space<vmem>>, vector<8x32xf32>
    tpu.vector_store %arg15[%c24_44, %c32_45], %154 {strides = array<i32>} : memref<64x64xf32, #tpu.memory_space<vmem>>, vector<8x32xf32>,
    %156 = vector.extract_strided_slice %13 {offsets = [40, 0], sizes = [8, 256], strides = [1, 1]} : vector<64x256xf32> to vector<8x256xf32>
    %157 = vector.extract_strided_slice %13 {offsets = [16, 0], sizes = [8, 256], strides = [1, 1]} : vector<64x256xf32> to vector<8x256xf32>
    %158 = arith.select %18, %156, %157 : vector<8x256xi1>, vector<8x256xf32>
    %cst_46 = arith.constant dense<0.000000e+00> : vector<8x256xf32>
    %159 = tpu.matmul %151, %20, %cst_46 {dimension_numbers = #tpu.dot_dimension_numbers<[1], [0], [0], [1], [0, 0, 1, 1], [], []>} : vector<8x64xf32>, vector<64x256xf32>, vector<8x256xf32> -> vector<8x256xf32>
    %160 = arith.addf %158, %159 : vector<8x256xf32>
    %161 = arith.negf %160 : vector<8x256xf32>
    %162 = math.exp %161 : vector<8x256xf32>
    %cst_47 = arith.constant 1.000000e+00 : f32
    %163 = vector.broadcast %cst_47 : f32 to vector<8x256xf32>
    %164 = arith.addf %163, %162 : vector<8x256xf32>
    %165 = arith.divf %163, %164 : vector<8x256xf32>
    %166 = vector.extract_strided_slice %165 {offsets = [0, 0], sizes = [8, 64], strides = [1, 1]} : vector<8x256xf32> to vector<8x64xf32>
    %167 = vector.extract_strided_slice %165 {offsets = [0, 64], sizes = [8, 64], strides = [1, 1]} : vector<8x256xf32> to vector<8x64xf32>
    %168 = vector.extract_strided_slice %165 {offsets = [0, 128], sizes = [8, 64], strides = [1, 1]} : vector<8x256xf32> to vector<8x64xf32>
    %cst_48 = arith.constant 2.000000e+00 : f32
    %169 = vector.broadcast %cst_48 : f32 to vector<8x64xf32>
    %170 = arith.mulf %169, %168 : vector<8x64xf32>
    %cst_49 = arith.constant 1.000000e+00 : f32
    %171 = vector.broadcast %cst_49 : f32 to vector<8x64xf32>
    %172 = arith.subf %170, %171 : vector<8x64xf32>
    %173 = vector.extract_strided_slice %165 {offsets = [0, 192], sizes = [8, 64], strides = [1, 1]} : vector<8x256xf32> to vector<8x64xf32>
    %174 = arith.mulf %167, %149 : vector<8x64xf32>
    %175 = arith.mulf %166, %172 : vector<8x64xf32>
    %176 = arith.addf %174, %175 : vector<8x64xf32>
    %177 = math.tanh %176 : vector<8x64xf32>
    %178 = arith.mulf %173, %177 : vector<8x64xf32>
    %179 = vector.extract_strided_slice %178 {offsets = [0, 0], sizes = [8, 32], strides = [1, 1]} : vector<8x64xf32> to vector<8x32xf32>
    %c40_50 = arith.constant 40 : index
    %c0_51 = arith.constant 0 : index
    %180 = vector.load %arg15[%c40_50, %c0_51] : memref<64x64xf32, #tpu.memory_space<vmem>>, vector<8x32xf32>
    tpu.vector_store %arg15[%c40_50, %c0_51], %179 {strides = array<i32>} : memref<64x64xf32, #tpu.memory_space<vmem>>, vector<8x32xf32>,
    %181 = vector.extract_strided_slice %178 {offsets = [0, 32], sizes = [8, 32], strides = [1, 1]} : vector<8x64xf32> to vector<8x32xf32>
    %c16_52 = arith.constant 16 : index
    %c32_53 = arith.constant 32 : index
    %182 = vector.load %arg15[%c16_52, %c32_53] : memref<64x64xf32, #tpu.memory_space<vmem>>, vector<8x32xf32>
    tpu.vector_store %arg15[%c16_52, %c32_53], %181 {strides = array<i32>} : memref<64x64xf32, #tpu.memory_space<vmem>>, vector<8x32xf32>,
    %183 = vector.extract_strided_slice %13 {offsets = [48, 0], sizes = [8, 256], strides = [1, 1]} : vector<64x256xf32> to vector<8x256xf32>
    %184 = vector.extract_strided_slice %13 {offsets = [8, 0], sizes = [8, 256], strides = [1, 1]} : vector<64x256xf32> to vector<8x256xf32>
    %185 = arith.select %18, %183, %184 : vector<8x256xi1>, vector<8x256xf32>
    %cst_54 = arith.constant dense<0.000000e+00> : vector<8x256xf32>
    %186 = tpu.matmul %178, %20, %cst_54 {dimension_numbers = #tpu.dot_dimension_numbers<[1], [0], [0], [1], [0, 0, 1, 1], [], []>} : vector<8x64xf32>, vector<64x256xf32>, vector<8x256xf32> -> vector<8x256xf32>
    %187 = arith.addf %185, %186 : vector<8x256xf32>
    %188 = arith.negf %187 : vector<8x256xf32>
    %189 = math.exp %188 : vector<8x256xf32>
    %cst_55 = arith.constant 1.000000e+00 : f32
    %190 = vector.broadcast %cst_55 : f32 to vector<8x256xf32>
    %191 = arith.addf %190, %189 : vector<8x256xf32>
    %192 = arith.divf %190, %191 : vector<8x256xf32>
    %193 = vector.extract_strided_slice %192 {offsets = [0, 0], sizes = [8, 64], strides = [1, 1]} : vector<8x256xf32> to vector<8x64xf32>
    %194 = vector.extract_strided_slice %192 {offsets = [0, 64], sizes = [8, 64], strides = [1, 1]} : vector<8x256xf32> to vector<8x64xf32>
    %195 = vector.extract_strided_slice %192 {offsets = [0, 128], sizes = [8, 64], strides = [1, 1]} : vector<8x256xf32> to vector<8x64xf32>
    %cst_56 = arith.constant 2.000000e+00 : f32
    %196 = vector.broadcast %cst_56 : f32 to vector<8x64xf32>
    %197 = arith.mulf %196, %195 : vector<8x64xf32>
    %cst_57 = arith.constant 1.000000e+00 : f32
    %198 = vector.broadcast %cst_57 : f32 to vector<8x64xf32>
    %199 = arith.subf %197, %198 : vector<8x64xf32>
    %200 = vector.extract_strided_slice %192 {offsets = [0, 192], sizes = [8, 64], strides = [1, 1]} : vector<8x256xf32> to vector<8x64xf32>
    %201 = arith.mulf %194, %176 : vector<8x64xf32>
    %202 = arith.mulf %193, %199 : vector<8x64xf32>
    %203 = arith.addf %201, %202 : vector<8x64xf32>
    %204 = math.tanh %203 : vector<8x64xf32>
    %205 = arith.mulf %200, %204 : vector<8x64xf32>
    %206 = vector.extract_strided_slice %205 {offsets = [0, 0], sizes = [8, 32], strides = [1, 1]} : vector<8x64xf32> to vector<8x32xf32>
    %c48_58 = arith.constant 48 : index
    %c0_59 = arith.constant 0 : index
    %207 = vector.load %arg15[%c48_58, %c0_59] : memref<64x64xf32, #tpu.memory_space<vmem>>, vector<8x32xf32>
    tpu.vector_store %arg15[%c48_58, %c0_59], %206 {strides = array<i32>} : memref<64x64xf32, #tpu.memory_space<vmem>>, vector<8x32xf32>,
    %208 = vector.extract_strided_slice %205 {offsets = [0, 32], sizes = [8, 32], strides = [1, 1]} : vector<8x64xf32> to vector<8x32xf32>
    %c8_60 = arith.constant 8 : index
    %c32_61 = arith.constant 32 : index
    %209 = vector.load %arg15[%c8_60, %c32_61] : memref<64x64xf32, #tpu.memory_space<vmem>>, vector<8x32xf32>
    tpu.vector_store %arg15[%c8_60, %c32_61], %208 {strides = array<i32>} : memref<64x64xf32, #tpu.memory_space<vmem>>, vector<8x32xf32>,
    %210 = vector.extract_strided_slice %13 {offsets = [56, 0], sizes = [8, 256], strides = [1, 1]} : vector<64x256xf32> to vector<8x256xf32>
    %211 = vector.extract_strided_slice %13 {offsets = [0, 0], sizes = [8, 256], strides = [1, 1]} : vector<64x256xf32> to vector<8x256xf32>
    %212 = arith.select %18, %210, %211 : vector<8x256xi1>, vector<8x256xf32>
    %cst_62 = arith.constant dense<0.000000e+00> : vector<8x256xf32>
    %213 = tpu.matmul %205, %20, %cst_62 {dimension_numbers = #tpu.dot_dimension_numbers<[1], [0], [0], [1], [0, 0, 1, 1], [], []>} : vector<8x64xf32>, vector<64x256xf32>, vector<8x256xf32> -> vector<8x256xf32>
    %214 = arith.addf %212, %213 : vector<8x256xf32>
    %215 = arith.negf %214 : vector<8x256xf32>
    %216 = math.exp %215 : vector<8x256xf32>
    %cst_63 = arith.constant 1.000000e+00 : f32
    %217 = vector.broadcast %cst_63 : f32 to vector<8x256xf32>
    %218 = arith.addf %217, %216 : vector<8x256xf32>
    %219 = arith.divf %217, %218 : vector<8x256xf32>
    %220 = vector.extract_strided_slice %219 {offsets = [0, 0], sizes = [8, 64], strides = [1, 1]} : vector<8x256xf32> to vector<8x64xf32>
    %221 = vector.extract_strided_slice %219 {offsets = [0, 64], sizes = [8, 64], strides = [1, 1]} : vector<8x256xf32> to vector<8x64xf32>
    %222 = vector.extract_strided_slice %219 {offsets = [0, 128], sizes = [8, 64], strides = [1, 1]} : vector<8x256xf32> to vector<8x64xf32>
    %cst_64 = arith.constant 2.000000e+00 : f32
    %223 = vector.broadcast %cst_64 : f32 to vector<8x64xf32>
    %224 = arith.mulf %223, %222 : vector<8x64xf32>
    %cst_65 = arith.constant 1.000000e+00 : f32
    %225 = vector.broadcast %cst_65 : f32 to vector<8x64xf32>
    %226 = arith.subf %224, %225 : vector<8x64xf32>
    %227 = vector.extract_strided_slice %219 {offsets = [0, 192], sizes = [8, 64], strides = [1, 1]} : vector<8x256xf32> to vector<8x64xf32>
    %228 = arith.mulf %221, %203 : vector<8x64xf32>
    %229 = arith.mulf %220, %226 : vector<8x64xf32>
    %230 = arith.addf %228, %229 : vector<8x64xf32>
    %231 = math.tanh %230 : vector<8x64xf32>
    %232 = arith.mulf %227, %231 : vector<8x64xf32>
    %233 = vector.extract_strided_slice %232 {offsets = [0, 0], sizes = [8, 32], strides = [1, 1]} : vector<8x64xf32> to vector<8x32xf32>
    %c56_66 = arith.constant 56 : index
    %c0_67 = arith.constant 0 : index
    %234 = vector.load %arg15[%c56_66, %c0_67] : memref<64x64xf32, #tpu.memory_space<vmem>>, vector<8x32xf32>
    tpu.vector_store %arg15[%c56_66, %c0_67], %233 {strides = array<i32>} : memref<64x64xf32, #tpu.memory_space<vmem>>, vector<8x32xf32>,
    %235 = vector.extract_strided_slice %232 {offsets = [0, 32], sizes = [8, 32], strides = [1, 1]} : vector<8x64xf32> to vector<8x32xf32>
    %c0_68 = arith.constant 0 : index
    %c32_69 = arith.constant 32 : index
    %236 = vector.load %arg15[%c0_68, %c32_69] : memref<64x64xf32, #tpu.memory_space<vmem>>, vector<8x32xf32>
    tpu.vector_store %arg15[%c0_68, %c32_69], %235 {strides = array<i32>} : memref<64x64xf32, #tpu.memory_space<vmem>>, vector<8x32xf32>,
    %c0_70 = arith.constant 0 : index
    %c0_71 = arith.constant 0 : index
    %237 = vector.load %arg15[%c0_70, %c0_71] : memref<64x64xf32, #tpu.memory_space<vmem>>, vector<64x64xf32>
    %c0_72 = arith.constant 0 : index
    %c0_73 = arith.constant 0 : index
    %238 = vector.load %arg5[%c0_72, %c0_73] : memref<64x256xf32, #tpu.memory_space<vmem>>, vector<64x256xf32>
    %cst_74 = arith.constant dense<0.000000e+00> : vector<64x256xf32>
    %239 = tpu.matmul %237, %238, %cst_74 {dimension_numbers = #tpu.dot_dimension_numbers<[1], [0], [0], [1], [0, 0, 1, 1], [], []>} : vector<64x64xf32>, vector<64x256xf32>, vector<64x256xf32> -> vector<64x256xf32>
    %c0_75 = arith.constant 0 : index
    %c0_76 = arith.constant 0 : index
    %240 = vector.load %arg6[%c0_75, %c0_76] : memref<1x256xf32, #tpu.memory_space<vmem>>, vector<1x256xf32>
    %241 = vector.broadcast %240 : vector<1x256xf32> to vector<64x256xf32>
    %242 = arith.addf %239, %241 : vector<64x256xf32>
    %c0_77 = arith.constant 0 : index
    %c0_78 = arith.constant 0 : index
    %243 = vector.load %arg7[%c0_77, %c0_78] : memref<64x256xf32, #tpu.memory_space<vmem>>, vector<64x256xf32>
    %244 = vector.extract_strided_slice %242 {offsets = [0, 0], sizes = [8, 256], strides = [1, 1]} : vector<64x256xf32> to vector<8x256xf32>
    %245 = vector.extract_strided_slice %242 {offsets = [56, 0], sizes = [8, 256], strides = [1, 1]} : vector<64x256xf32> to vector<8x256xf32>
    %246 = arith.select %18, %244, %245 : vector<8x256xi1>, vector<8x256xf32>
    %cst_79 = arith.constant dense<0.000000e+00> : vector<8x256xf32>
    %247 = tpu.matmul %19, %243, %cst_79 {dimension_numbers = #tpu.dot_dimension_numbers<[1], [0], [0], [1], [0, 0, 1, 1], [], []>} : vector<8x64xf32>, vector<64x256xf32>, vector<8x256xf32> -> vector<8x256xf32>
    %248 = arith.addf %246, %247 : vector<8x256xf32>
    %249 = arith.negf %248 : vector<8x256xf32>
    %250 = math.exp %249 : vector<8x256xf32>
    %cst_80 = arith.constant 1.000000e+00 : f32
    %251 = vector.broadcast %cst_80 : f32 to vector<8x256xf32>
    %252 = arith.addf %251, %250 : vector<8x256xf32>
    %253 = arith.divf %251, %252 : vector<8x256xf32>
    %254 = vector.extract_strided_slice %253 {offsets = [0, 0], sizes = [8, 64], strides = [1, 1]} : vector<8x256xf32> to vector<8x64xf32>
    %255 = vector.extract_strided_slice %253 {offsets = [0, 64], sizes = [8, 64], strides = [1, 1]} : vector<8x256xf32> to vector<8x64xf32>
    %256 = vector.extract_strided_slice %253 {offsets = [0, 128], sizes = [8, 64], strides = [1, 1]} : vector<8x256xf32> to vector<8x64xf32>
    %cst_81 = arith.constant 2.000000e+00 : f32
    %257 = vector.broadcast %cst_81 : f32 to vector<8x64xf32>
    %258 = arith.mulf %257, %256 : vector<8x64xf32>
    %cst_82 = arith.constant 1.000000e+00 : f32
    %259 = vector.broadcast %cst_82 : f32 to vector<8x64xf32>
    %260 = arith.subf %258, %259 : vector<8x64xf32>
    %261 = vector.extract_strided_slice %253 {offsets = [0, 192], sizes = [8, 64], strides = [1, 1]} : vector<8x256xf32> to vector<8x64xf32>
    %262 = arith.mulf %255, %19 : vector<8x64xf32>
    %263 = arith.mulf %254, %260 : vector<8x64xf32>
    %264 = arith.addf %262, %263 : vector<8x64xf32>
    %265 = math.tanh %264 : vector<8x64xf32>
    %266 = arith.mulf %261, %265 : vector<8x64xf32>
    %267 = vector.extract_strided_slice %242 {offsets = [8, 0], sizes = [8, 256], strides = [1, 1]} : vector<64x256xf32> to vector<8x256xf32>
    %268 = vector.extract_strided_slice %242 {offsets = [48, 0], sizes = [8, 256], strides = [1, 1]} : vector<64x256xf32> to vector<8x256xf32>
    %269 = arith.select %18, %267, %268 : vector<8x256xi1>, vector<8x256xf32>
    %cst_83 = arith.constant dense<0.000000e+00> : vector<8x256xf32>
    %270 = tpu.matmul %266, %243, %cst_83 {dimension_numbers = #tpu.dot_dimension_numbers<[1], [0], [0], [1], [0, 0, 1, 1], [], []>} : vector<8x64xf32>, vector<64x256xf32>, vector<8x256xf32> -> vector<8x256xf32>
    %271 = arith.addf %269, %270 : vector<8x256xf32>
    %272 = arith.negf %271 : vector<8x256xf32>
    %273 = math.exp %272 : vector<8x256xf32>
    %cst_84 = arith.constant 1.000000e+00 : f32
    %274 = vector.broadcast %cst_84 : f32 to vector<8x256xf32>
    %275 = arith.addf %274, %273 : vector<8x256xf32>
    %276 = arith.divf %274, %275 : vector<8x256xf32>
    %277 = vector.extract_strided_slice %276 {offsets = [0, 0], sizes = [8, 64], strides = [1, 1]} : vector<8x256xf32> to vector<8x64xf32>
    %278 = vector.extract_strided_slice %276 {offsets = [0, 64], sizes = [8, 64], strides = [1, 1]} : vector<8x256xf32> to vector<8x64xf32>
    %279 = vector.extract_strided_slice %276 {offsets = [0, 128], sizes = [8, 64], strides = [1, 1]} : vector<8x256xf32> to vector<8x64xf32>
    %cst_85 = arith.constant 2.000000e+00 : f32
    %280 = vector.broadcast %cst_85 : f32 to vector<8x64xf32>
    %281 = arith.mulf %280, %279 : vector<8x64xf32>
    %cst_86 = arith.constant 1.000000e+00 : f32
    %282 = vector.broadcast %cst_86 : f32 to vector<8x64xf32>
    %283 = arith.subf %281, %282 : vector<8x64xf32>
    %284 = vector.extract_strided_slice %276 {offsets = [0, 192], sizes = [8, 64], strides = [1, 1]} : vector<8x256xf32> to vector<8x64xf32>
    %285 = arith.mulf %278, %264 : vector<8x64xf32>
    %286 = arith.mulf %277, %283 : vector<8x64xf32>
    %287 = arith.addf %285, %286 : vector<8x64xf32>
    %288 = math.tanh %287 : vector<8x64xf32>
    %289 = arith.mulf %284, %288 : vector<8x64xf32>
    %290 = vector.extract_strided_slice %242 {offsets = [16, 0], sizes = [8, 256], strides = [1, 1]} : vector<64x256xf32> to vector<8x256xf32>
    %291 = vector.extract_strided_slice %242 {offsets = [40, 0], sizes = [8, 256], strides = [1, 1]} : vector<64x256xf32> to vector<8x256xf32>
    %292 = arith.select %18, %290, %291 : vector<8x256xi1>, vector<8x256xf32>
    %cst_87 = arith.constant dense<0.000000e+00> : vector<8x256xf32>
    %293 = tpu.matmul %289, %243, %cst_87 {dimension_numbers = #tpu.dot_dimension_numbers<[1], [0], [0], [1], [0, 0, 1, 1], [], []>} : vector<8x64xf32>, vector<64x256xf32>, vector<8x256xf32> -> vector<8x256xf32>
    %294 = arith.addf %292, %293 : vector<8x256xf32>
    %295 = arith.negf %294 : vector<8x256xf32>
    %296 = math.exp %295 : vector<8x256xf32>
    %cst_88 = arith.constant 1.000000e+00 : f32
    %297 = vector.broadcast %cst_88 : f32 to vector<8x256xf32>
    %298 = arith.addf %297, %296 : vector<8x256xf32>
    %299 = arith.divf %297, %298 : vector<8x256xf32>
    %300 = vector.extract_strided_slice %299 {offsets = [0, 0], sizes = [8, 64], strides = [1, 1]} : vector<8x256xf32> to vector<8x64xf32>
    %301 = vector.extract_strided_slice %299 {offsets = [0, 64], sizes = [8, 64], strides = [1, 1]} : vector<8x256xf32> to vector<8x64xf32>
    %302 = vector.extract_strided_slice %299 {offsets = [0, 128], sizes = [8, 64], strides = [1, 1]} : vector<8x256xf32> to vector<8x64xf32>
    %cst_89 = arith.constant 2.000000e+00 : f32
    %303 = vector.broadcast %cst_89 : f32 to vector<8x64xf32>
    %304 = arith.mulf %303, %302 : vector<8x64xf32>
    %cst_90 = arith.constant 1.000000e+00 : f32
    %305 = vector.broadcast %cst_90 : f32 to vector<8x64xf32>
    %306 = arith.subf %304, %305 : vector<8x64xf32>
    %307 = vector.extract_strided_slice %299 {offsets = [0, 192], sizes = [8, 64], strides = [1, 1]} : vector<8x256xf32> to vector<8x64xf32>
    %308 = arith.mulf %301, %287 : vector<8x64xf32>
    %309 = arith.mulf %300, %306 : vector<8x64xf32>
    %310 = arith.addf %308, %309 : vector<8x64xf32>
    %311 = math.tanh %310 : vector<8x64xf32>
    %312 = arith.mulf %307, %311 : vector<8x64xf32>
    %313 = vector.extract_strided_slice %242 {offsets = [24, 0], sizes = [8, 256], strides = [1, 1]} : vector<64x256xf32> to vector<8x256xf32>
    %314 = vector.extract_strided_slice %242 {offsets = [32, 0], sizes = [8, 256], strides = [1, 1]} : vector<64x256xf32> to vector<8x256xf32>
    %315 = arith.select %18, %313, %314 : vector<8x256xi1>, vector<8x256xf32>
    %cst_91 = arith.constant dense<0.000000e+00> : vector<8x256xf32>
    %316 = tpu.matmul %312, %243, %cst_91 {dimension_numbers = #tpu.dot_dimension_numbers<[1], [0], [0], [1], [0, 0, 1, 1], [], []>} : vector<8x64xf32>, vector<64x256xf32>, vector<8x256xf32> -> vector<8x256xf32>
    %317 = arith.addf %315, %316 : vector<8x256xf32>
    %318 = arith.negf %317 : vector<8x256xf32>
    %319 = math.exp %318 : vector<8x256xf32>
    %cst_92 = arith.constant 1.000000e+00 : f32
    %320 = vector.broadcast %cst_92 : f32 to vector<8x256xf32>
    %321 = arith.addf %320, %319 : vector<8x256xf32>
    %322 = arith.divf %320, %321 : vector<8x256xf32>
    %323 = vector.extract_strided_slice %322 {offsets = [0, 0], sizes = [8, 64], strides = [1, 1]} : vector<8x256xf32> to vector<8x64xf32>
    %324 = vector.extract_strided_slice %322 {offsets = [0, 64], sizes = [8, 64], strides = [1, 1]} : vector<8x256xf32> to vector<8x64xf32>
    %325 = vector.extract_strided_slice %322 {offsets = [0, 128], sizes = [8, 64], strides = [1, 1]} : vector<8x256xf32> to vector<8x64xf32>
    %cst_93 = arith.constant 2.000000e+00 : f32
    %326 = vector.broadcast %cst_93 : f32 to vector<8x64xf32>
    %327 = arith.mulf %326, %325 : vector<8x64xf32>
    %cst_94 = arith.constant 1.000000e+00 : f32
    %328 = vector.broadcast %cst_94 : f32 to vector<8x64xf32>
    %329 = arith.subf %327, %328 : vector<8x64xf32>
    %330 = vector.extract_strided_slice %322 {offsets = [0, 192], sizes = [8, 64], strides = [1, 1]} : vector<8x256xf32> to vector<8x64xf32>
    %331 = arith.mulf %324, %310 : vector<8x64xf32>
    %332 = arith.mulf %323, %329 : vector<8x64xf32>
    %333 = arith.addf %331, %332 : vector<8x64xf32>
    %334 = math.tanh %333 : vector<8x64xf32>
    %335 = arith.mulf %330, %334 : vector<8x64xf32>
    %336 = vector.extract_strided_slice %242 {offsets = [32, 0], sizes = [8, 256], strides = [1, 1]} : vector<64x256xf32> to vector<8x256xf32>
    %337 = vector.extract_strided_slice %242 {offsets = [24, 0], sizes = [8, 256], strides = [1, 1]} : vector<64x256xf32> to vector<8x256xf32>
    %338 = arith.select %18, %336, %337 : vector<8x256xi1>, vector<8x256xf32>
    %cst_95 = arith.constant dense<0.000000e+00> : vector<8x256xf32>
    %339 = tpu.matmul %335, %243, %cst_95 {dimension_numbers = #tpu.dot_dimension_numbers<[1], [0], [0], [1], [0, 0, 1, 1], [], []>} : vector<8x64xf32>, vector<64x256xf32>, vector<8x256xf32> -> vector<8x256xf32>
    %340 = arith.addf %338, %339 : vector<8x256xf32>
    %341 = arith.negf %340 : vector<8x256xf32>
    %342 = math.exp %341 : vector<8x256xf32>
    %cst_96 = arith.constant 1.000000e+00 : f32
    %343 = vector.broadcast %cst_96 : f32 to vector<8x256xf32>
    %344 = arith.addf %343, %342 : vector<8x256xf32>
    %345 = arith.divf %343, %344 : vector<8x256xf32>
    %346 = vector.extract_strided_slice %345 {offsets = [0, 0], sizes = [8, 64], strides = [1, 1]} : vector<8x256xf32> to vector<8x64xf32>
    %347 = vector.extract_strided_slice %345 {offsets = [0, 64], sizes = [8, 64], strides = [1, 1]} : vector<8x256xf32> to vector<8x64xf32>
    %348 = vector.extract_strided_slice %345 {offsets = [0, 128], sizes = [8, 64], strides = [1, 1]} : vector<8x256xf32> to vector<8x64xf32>
    %cst_97 = arith.constant 2.000000e+00 : f32
    %349 = vector.broadcast %cst_97 : f32 to vector<8x64xf32>
    %350 = arith.mulf %349, %348 : vector<8x64xf32>
    %cst_98 = arith.constant 1.000000e+00 : f32
    %351 = vector.broadcast %cst_98 : f32 to vector<8x64xf32>
    %352 = arith.subf %350, %351 : vector<8x64xf32>
    %353 = vector.extract_strided_slice %345 {offsets = [0, 192], sizes = [8, 64], strides = [1, 1]} : vector<8x256xf32> to vector<8x64xf32>
    %354 = arith.mulf %347, %333 : vector<8x64xf32>
    %355 = arith.mulf %346, %352 : vector<8x64xf32>
    %356 = arith.addf %354, %355 : vector<8x64xf32>
    %357 = math.tanh %356 : vector<8x64xf32>
    %358 = arith.mulf %353, %357 : vector<8x64xf32>
    %359 = vector.extract_strided_slice %242 {offsets = [40, 0], sizes = [8, 256], strides = [1, 1]} : vector<64x256xf32> to vector<8x256xf32>
    %360 = vector.extract_strided_slice %242 {offsets = [16, 0], sizes = [8, 256], strides = [1, 1]} : vector<64x256xf32> to vector<8x256xf32>
    %361 = arith.select %18, %359, %360 : vector<8x256xi1>, vector<8x256xf32>
    %cst_99 = arith.constant dense<0.000000e+00> : vector<8x256xf32>
    %362 = tpu.matmul %358, %243, %cst_99 {dimension_numbers = #tpu.dot_dimension_numbers<[1], [0], [0], [1], [0, 0, 1, 1], [], []>} : vector<8x64xf32>, vector<64x256xf32>, vector<8x256xf32> -> vector<8x256xf32>
    %363 = arith.addf %361, %362 : vector<8x256xf32>
    %364 = arith.negf %363 : vector<8x256xf32>
    %365 = math.exp %364 : vector<8x256xf32>
    %cst_100 = arith.constant 1.000000e+00 : f32
    %366 = vector.broadcast %cst_100 : f32 to vector<8x256xf32>
    %367 = arith.addf %366, %365 : vector<8x256xf32>
    %368 = arith.divf %366, %367 : vector<8x256xf32>
    %369 = vector.extract_strided_slice %368 {offsets = [0, 0], sizes = [8, 64], strides = [1, 1]} : vector<8x256xf32> to vector<8x64xf32>
    %370 = vector.extract_strided_slice %368 {offsets = [0, 64], sizes = [8, 64], strides = [1, 1]} : vector<8x256xf32> to vector<8x64xf32>
    %371 = vector.extract_strided_slice %368 {offsets = [0, 128], sizes = [8, 64], strides = [1, 1]} : vector<8x256xf32> to vector<8x64xf32>
    %cst_101 = arith.constant 2.000000e+00 : f32
    %372 = vector.broadcast %cst_101 : f32 to vector<8x64xf32>
    %373 = arith.mulf %372, %371 : vector<8x64xf32>
    %cst_102 = arith.constant 1.000000e+00 : f32
    %374 = vector.broadcast %cst_102 : f32 to vector<8x64xf32>
    %375 = arith.subf %373, %374 : vector<8x64xf32>
    %376 = vector.extract_strided_slice %368 {offsets = [0, 192], sizes = [8, 64], strides = [1, 1]} : vector<8x256xf32> to vector<8x64xf32>
    %377 = arith.mulf %370, %356 : vector<8x64xf32>
    %378 = arith.mulf %369, %375 : vector<8x64xf32>
    %379 = arith.addf %377, %378 : vector<8x64xf32>
    %380 = math.tanh %379 : vector<8x64xf32>
    %381 = arith.mulf %376, %380 : vector<8x64xf32>
    %382 = vector.extract_strided_slice %242 {offsets = [48, 0], sizes = [8, 256], strides = [1, 1]} : vector<64x256xf32> to vector<8x256xf32>
    %383 = vector.extract_strided_slice %242 {offsets = [8, 0], sizes = [8, 256], strides = [1, 1]} : vector<64x256xf32> to vector<8x256xf32>
    %384 = arith.select %18, %382, %383 : vector<8x256xi1>, vector<8x256xf32>
    %cst_103 = arith.constant dense<0.000000e+00> : vector<8x256xf32>
    %385 = tpu.matmul %381, %243, %cst_103 {dimension_numbers = #tpu.dot_dimension_numbers<[1], [0], [0], [1], [0, 0, 1, 1], [], []>} : vector<8x64xf32>, vector<64x256xf32>, vector<8x256xf32> -> vector<8x256xf32>
    %386 = arith.addf %384, %385 : vector<8x256xf32>
    %387 = arith.negf %386 : vector<8x256xf32>
    %388 = math.exp %387 : vector<8x256xf32>
    %cst_104 = arith.constant 1.000000e+00 : f32
    %389 = vector.broadcast %cst_104 : f32 to vector<8x256xf32>
    %390 = arith.addf %389, %388 : vector<8x256xf32>
    %391 = arith.divf %389, %390 : vector<8x256xf32>
    %392 = vector.extract_strided_slice %391 {offsets = [0, 0], sizes = [8, 64], strides = [1, 1]} : vector<8x256xf32> to vector<8x64xf32>
    %393 = vector.extract_strided_slice %391 {offsets = [0, 64], sizes = [8, 64], strides = [1, 1]} : vector<8x256xf32> to vector<8x64xf32>
    %394 = vector.extract_strided_slice %391 {offsets = [0, 128], sizes = [8, 64], strides = [1, 1]} : vector<8x256xf32> to vector<8x64xf32>
    %cst_105 = arith.constant 2.000000e+00 : f32
    %395 = vector.broadcast %cst_105 : f32 to vector<8x64xf32>
    %396 = arith.mulf %395, %394 : vector<8x64xf32>
    %cst_106 = arith.constant 1.000000e+00 : f32
    %397 = vector.broadcast %cst_106 : f32 to vector<8x64xf32>
    %398 = arith.subf %396, %397 : vector<8x64xf32>
    %399 = vector.extract_strided_slice %391 {offsets = [0, 192], sizes = [8, 64], strides = [1, 1]} : vector<8x256xf32> to vector<8x64xf32>
    %400 = arith.mulf %393, %379 : vector<8x64xf32>
    %401 = arith.mulf %392, %398 : vector<8x64xf32>
    %402 = arith.addf %400, %401 : vector<8x64xf32>
    %403 = math.tanh %402 : vector<8x64xf32>
    %404 = arith.mulf %399, %403 : vector<8x64xf32>
    %405 = vector.extract_strided_slice %242 {offsets = [56, 0], sizes = [8, 256], strides = [1, 1]} : vector<64x256xf32> to vector<8x256xf32>
    %406 = vector.extract_strided_slice %242 {offsets = [0, 0], sizes = [8, 256], strides = [1, 1]} : vector<64x256xf32> to vector<8x256xf32>
    %407 = arith.select %18, %405, %406 : vector<8x256xi1>, vector<8x256xf32>
    %cst_107 = arith.constant dense<0.000000e+00> : vector<8x256xf32>
    %408 = tpu.matmul %404, %243, %cst_107 {dimension_numbers = #tpu.dot_dimension_numbers<[1], [0], [0], [1], [0, 0, 1, 1], [], []>} : vector<8x64xf32>, vector<64x256xf32>, vector<8x256xf32> -> vector<8x256xf32>
    %409 = arith.addf %407, %408 : vector<8x256xf32>
    %410 = arith.negf %409 : vector<8x256xf32>
    %411 = math.exp %410 : vector<8x256xf32>
    %cst_108 = arith.constant 1.000000e+00 : f32
    %412 = vector.broadcast %cst_108 : f32 to vector<8x256xf32>
    %413 = arith.addf %412, %411 : vector<8x256xf32>
    %414 = arith.divf %412, %413 : vector<8x256xf32>
    %415 = vector.extract_strided_slice %414 {offsets = [0, 0], sizes = [8, 64], strides = [1, 1]} : vector<8x256xf32> to vector<8x64xf32>
    %416 = vector.extract_strided_slice %414 {offsets = [0, 64], sizes = [8, 64], strides = [1, 1]} : vector<8x256xf32> to vector<8x64xf32>
    %417 = vector.extract_strided_slice %414 {offsets = [0, 128], sizes = [8, 64], strides = [1, 1]} : vector<8x256xf32> to vector<8x64xf32>
    %cst_109 = arith.constant 2.000000e+00 : f32
    %418 = vector.broadcast %cst_109 : f32 to vector<8x64xf32>
    %419 = arith.mulf %418, %417 : vector<8x64xf32>
    %cst_110 = arith.constant 1.000000e+00 : f32
    %420 = vector.broadcast %cst_110 : f32 to vector<8x64xf32>
    %421 = arith.subf %419, %420 : vector<8x64xf32>
    %422 = vector.extract_strided_slice %414 {offsets = [0, 192], sizes = [8, 64], strides = [1, 1]} : vector<8x256xf32> to vector<8x64xf32>
    %423 = arith.mulf %416, %402 : vector<8x64xf32>
    %424 = arith.mulf %415, %421 : vector<8x64xf32>
    %425 = arith.addf %423, %424 : vector<8x64xf32>
    %426 = math.tanh %425 : vector<8x64xf32>
    %427 = arith.mulf %422, %426 : vector<8x64xf32>
    %c0_111 = arith.constant 0 : index
    %c0_112 = arith.constant 0 : index
    %428 = vector.load %arg8[%c0_111, %c0_112] : memref<64x128xf32, #tpu.memory_space<vmem>>, vector<64x128xf32>
    %cst_113 = arith.constant dense<0.000000e+00> : vector<8x128xf32>
    %429 = tpu.matmul %427, %428, %cst_113 {dimension_numbers = #tpu.dot_dimension_numbers<[1], [0], [0], [1], [0, 0, 1, 1], [], []>} : vector<8x64xf32>, vector<64x128xf32>, vector<8x128xf32> -> vector<8x128xf32>
    %c0_114 = arith.constant 0 : index
    %c0_115 = arith.constant 0 : index
    %430 = vector.load %arg9[%c0_114, %c0_115] : memref<1x128xf32, #tpu.memory_space<vmem>>, vector<1x128xf32>
    %431 = vector.broadcast %430 : vector<1x128xf32> to vector<8x128xf32>
    %432 = arith.addf %429, %431 : vector<8x128xf32>
    %cst_116 = arith.constant 0.000000e+00 : f32
    %433 = vector.broadcast %cst_116 : f32 to vector<8x128xf32>
    %434 = arith.maximumf %432, %433 : vector<8x128xf32>
    %c0_117 = arith.constant 0 : index
    %c0_118 = arith.constant 0 : index
    %435 = vector.load %arg10[%c0_117, %c0_118] : memref<128x128xf32, #tpu.memory_space<vmem>>, vector<128x128xf32>
    %cst_119 = arith.constant dense<0.000000e+00> : vector<8x128xf32>
    %436 = tpu.matmul %434, %435, %cst_119 {dimension_numbers = #tpu.dot_dimension_numbers<[1], [0], [0], [1], [0, 0, 1, 1], [], []>} : vector<8x128xf32>, vector<128x128xf32>, vector<8x128xf32> -> vector<8x128xf32>
    %c0_120 = arith.constant 0 : index
    %c0_121 = arith.constant 0 : index
    %437 = vector.load %arg11[%c0_120, %c0_121] : memref<1x128xf32, #tpu.memory_space<vmem>>, vector<1x128xf32>
    %438 = vector.broadcast %437 : vector<1x128xf32> to vector<8x128xf32>
    %439 = arith.addf %436, %438 : vector<8x128xf32>
    %cst_122 = arith.constant 0.000000e+00 : f32
    %440 = vector.broadcast %cst_122 : f32 to vector<8x128xf32>
    %441 = arith.maximumf %439, %440 : vector<8x128xf32>
    %c0_123 = arith.constant 0 : index
    %c0_124 = arith.constant 0 : index
    %442 = vector.load %arg12[%c0_123, %c0_124] : memref<128x128xf32, #tpu.memory_space<vmem>>, vector<128x128xf32>
    %cst_125 = arith.constant dense<0.000000e+00> : vector<8x128xf32>
    %443 = tpu.matmul %441, %442, %cst_125 {dimension_numbers = #tpu.dot_dimension_numbers<[1], [0], [0], [1], [0, 0, 1, 1], [], []>} : vector<8x128xf32>, vector<128x128xf32>, vector<8x128xf32> -> vector<8x128xf32>
    %c0_126 = arith.constant 0 : index
    %c0_127 = arith.constant 0 : index
    %444 = vector.load %arg13[%c0_126, %c0_127] : memref<1x128xf32, #tpu.memory_space<vmem>>, vector<1x128xf32>
    %445 = vector.broadcast %444 : vector<1x128xf32> to vector<8x128xf32>
    %446 = arith.addf %443, %445 : vector<8x128xf32>
    %cst_128 = arith.constant dense<0xFF800000> : vector<8xf32>
    %447 = vector.multi_reduction <maximumf>, %446, %cst_128 [1] : vector<8x128xf32> to vector<8xf32>
    %448 = vector.shape_cast %447 : vector<8xf32> to vector<8x1xf32>
    %449 = vector.broadcast %448 : vector<8x1xf32> to vector<8x128xf32>
    %450 = arith.subf %446, %449 : vector<8x128xf32>
    %451 = math.exp %450 : vector<8x128xf32>
    %cst_129 = arith.constant dense<0.000000e+00> : vector<8xf32>
    %452 = vector.multi_reduction <add>, %451, %cst_129 [1] : vector<8x128xf32> to vector<8xf32>
    %453 = vector.shape_cast %452 : vector<8xf32> to vector<8x1xf32>
    %454 = math.log %453 : vector<8x1xf32>
    %455 = vector.broadcast %454 : vector<8x1xf32> to vector<8x128xf32>
    %456 = arith.subf %450, %455 : vector<8x128xf32>
    %c0_130 = arith.constant 0 : index
    %c0_131 = arith.constant 0 : index
    %457 = vector.load %arg14[%c0_130, %c0_131] : memref<8x128xf32, #tpu.memory_space<vmem>>, vector<8x128xf32>
    tpu.vector_store %arg14[%c0_130, %c0_131], %456 {strides = array<i32>} : memref<8x128xf32, #tpu.memory_space<vmem>>, vector<8x128xf32>,
    return
  }
}

</mosaic_0001>

<bundles_post_ra>
// kernel: tpu_custom_call.1
= control target key start
LH: loop header
LB: loop body
LE: loop exit
PB: predicated region body
PF: predicated region fallthrough
CT: control target
= control target key end

     0   :  { %19 = vsyncpa [#allocation4], 0  ;;  %s4611_s0 = inlined_call_operand.vmem [shape: s32[64,1], index: 0, kind: input, shape index: {}]   ;;  %s4612_s1 = inlined_call_operand.vmem [shape: f32[50,32], index: 1, kind: input, shape index: {}]   ;;  %s4613_s2 = inlined_call_operand.hbm [shape: f32[32,256], index: 2, kind: input, shape index: {}]   ;;  %s4614_s3 = inlined_call_operand.vmem [shape: f32[1,256], index: 3, kind: input, shape index: {}]   ;;  %s4615_s4 = inlined_call_operand.vmem [shape: f32[64,256], index: 4, kind: input, shape index: {}]   ;;  %s4616_s5 = inlined_call_operand.hbm [shape: f32[64,256], index: 5, kind: input, shape index: {}]   ;;  %s4617_s6 = inlined_call_operand.vmem [shape: f32[1,256], index: 6, kind: input, shape index: {}]   ;;  %s4618_s7 = inlined_call_operand.hbm [shape: f32[64,256], index: 7, kind: input, shape index: {}]   ;;  %s4619_s8 = inlined_call_operand.hbm [shape: f32[64,128], index: 8, kind: input, shape index: {}]   ;;  %s4620_s9 = inlined_call_operand.vmem [shape: f32[1,128], index: 9, kind: input, shape index: {}]   ;;  %s4621_s10 = inlined_call_operand.hbm [shape: f32[128,128], index: 10, kind: input, shape index: {}]   ;;  %s4622_s11 = inlined_call_operand.vmem [shape: f32[1,128], index: 11, kind: input, shape index: {}]   ;;  %s4623_s12 = inlined_call_operand.hbm [shape: f32[128,128], index: 12, kind: input, shape index: {}]   ;;  %s4624_s13 = inlined_call_operand.vmem [shape: f32[1,128], index: 13, kind: input, shape index: {}]   ;;  %s4625_s14 = inlined_call_operand.hbm [shape: f32[8,128], index: 14, kind: output, shape index: {}]  }
   0x1   :  { %20 = vsyncpa [#allocation7], 0 }
   0x2   :  { %21 = vsyncpa [#allocation10], 0 }
   0x3   :  { %22 = vsyncpa [#allocation13], 0 }
   0x4   :  { %23 = vsyncpa [#allocation5], 0  ;;  %s3628_s29 = smov [#allocation6]   ;;  %s3629_s15 = smov [#allocation9]  }
   0x5   :  { %s49_s30 = sshll.u32 %s3628_s29, 4  ;;  %s75_s16 = sshll.u32 %s3629_s15, 4  ;;  %s50_s30 = int_to_ptr.vmem [resolvable:$true] %s49_s30  ;;  %s3719_s16 = int_to_ptr.vmem [resolvable:$true] %s75_s16 }
   0x6   :  { %s3464_s19 = scalar_lea.hbm %s4616_s5, 2048 }
   0x7   :  { %p3465_p0 = scmp.ne.s32.totalorder %s4616_s5, %s3464_s19  ;;  %p3468_p1 = scmp.lt.u32.totalorder %s3464_s19, %s4616_s5 }
   0x9   :  { %p3470_p2 = pnand %p3468_p1, %p3465_p0 }
   0xb   :  { %3473 = shalt.err (!%p3470_p2)
}
   0xc   :  { %s3474_s24 = scalar_lea.vmem %s50_s30, 2048  ;;  %p3479_p4 = scmp.lt.s32.totalorder %s50_s30, %s50_s30 }
   0xd   :  { %p3475_p3 = scmp.ne.s32.totalorder %s50_s30, %s3474_s24  ;;  %p3480_p5 = scmp.lt.s32.totalorder %s3474_s24, %s3474_s24 }
   0xf   :  { %p3481_p6 = por %p3480_p5, %p3479_p4 }
  0x11   :  { %p3482_p7 = pnand %p3481_p6, %p3475_p3 }
  0x13   :  { %3485 = shalt.err (!%p3482_p7)
}
  0x14   :  { %s4626_s25 = smov 256   ;;  %s3631_s26 = smov 16  }
  0x15   :  { %55 = dma.hbm_to_vmem [thread:$0]  %s4616_s5, 2048, %s50_s30, [#allocation7], %s4626_s25, %s4626_s25, %s3631_s26  }
  0x16   :  { %s3486_s17 = scalar_lea.hbm %s4619_s8, 1024 }
  0x17   :  { %p3487_p8 = scmp.ne.s32.totalorder %s4619_s8, %s3486_s17  ;;  %p3490_p9 = scmp.lt.u32.totalorder %s3486_s17, %s4619_s8 }
  0x19   :  { %p3492_p10 = pnand %p3490_p9, %p3487_p8 }
  0x1b   :  { %3495 = shalt.err (!%p3492_p10)
}
  0x1c   :  { %s3496_s22 = scalar_lea.vmem %s3719_s16, 1024  ;;  %p3501_p12 = scmp.lt.s32.totalorder %s3719_s16, %s3719_s16 }
  0x1d   :  { %p3497_p11 = scmp.ne.s32.totalorder %s3719_s16, %s3496_s22  ;;  %p3502_p13 = scmp.lt.s32.totalorder %s3496_s22, %s3496_s22 }
  0x1f   :  { %p3503_p0 = por %p3502_p13, %p3501_p12 }
  0x21   :  { %p3504_p1 = pnand %p3503_p0, %p3497_p11 }
  0x23   :  { %3507 = shalt.err (!%p3504_p1)
}
  0x24   :  { %s3632_s5 = smov 128   ;;  %s3633_s30 = smov 8  }
  0x25   :  { %81 = dma.hbm_to_vmem [thread:$0]  %s4619_s8, 1024, %s3719_s16, [#allocation10], %s3632_s5, %s3632_s5, %s3633_s30  }
  0x26   :  { %s3634_s27 = smov [#allocation3]   ;;  %s3635_s29 = smov [#allocation8]  }
  0x27   :  { %s33_s28 = sshll.u32 %s3634_s27, 4  ;;  %s63_s15 = sshll.u32 %s3635_s29, 4  ;;  %s34_s28 = int_to_ptr.vmem [resolvable:$true] %s33_s28  ;;  %s3756_s15 = int_to_ptr.vmem [resolvable:$true] %s63_s15 }
  0x28   :  { %s3508_s19 = scalar_lea.hbm %s4613_s2, 1024 }
  0x29   :  { %p3509_p2 = scmp.ne.s32.totalorder %s4613_s2, %s3508_s19  ;;  %p3512_p3 = scmp.lt.u32.totalorder %s3508_s19, %s4613_s2 }
  0x2b   :  { %p3514_p4 = pnand %p3512_p3, %p3509_p2 }
  0x2d   :  { %3517 = shalt.err (!%p3514_p4)
}
  0x2e   :  { %s3518_s8 = scalar_lea.vmem %s34_s28, 1024  ;;  %p3523_p6 = scmp.lt.s32.totalorder %s34_s28, %s34_s28 }
  0x2f   :  { %p3519_p5 = scmp.ne.s32.totalorder %s34_s28, %s3518_s8  ;;  %p3524_p7 = scmp.lt.s32.totalorder %s3518_s8, %s3518_s8 }
  0x31   :  { %p3525_p8 = por %p3524_p7, %p3523_p6 }
  0x33   :  { %p3526_p9 = pnand %p3525_p8, %p3519_p5 }
  0x35   :  { %3529 = shalt.err (!%p3526_p9)
}
  0x36   :  { %s4628_s16 = smov 256   ;;  %s3530_s25 = scalar_lea.hbm %s4618_s7, 2048 }
  0x37   :  { %39 = dma.hbm_to_vmem [thread:$0]  %s4613_s2, 1024, %s34_s28, [#allocation4], %s4628_s16, %s4628_s16, %s3631_s26  }
  0x38   :  { %p3531_p10 = scmp.ne.s32.totalorder %s4618_s7, %s3530_s25  ;;  %p3534_p11 = scmp.lt.u32.totalorder %s3530_s25, %s4618_s7 }
  0x3a   :  { %p3536_p12 = pnand %p3534_p11, %p3531_p10 }
  0x3c   :  { %3539 = shalt.err (!%p3536_p12)
}
  0x3d   :  { %s3540_s21 = scalar_lea.vmem %s3756_s15, 2048  ;;  %p3545_p0 = scmp.lt.s32.totalorder %s3756_s15, %s3756_s15 }
  0x3e   :  { %p3541_p13 = scmp.ne.s32.totalorder %s3756_s15, %s3540_s21  ;;  %p3546_p1 = scmp.lt.s32.totalorder %s3540_s21, %s3540_s21 }
  0x40   :  { %p3547_p2 = por %p3546_p1, %p3545_p0 }
  0x42   :  { %p3548_p3 = pnand %p3547_p2, %p3541_p13 }
  0x44   :  { %3551 = shalt.err (!%p3548_p3)
}
  0x45   :  { %69 = dma.hbm_to_vmem [thread:$0]  %s4618_s7, 2048, %s3756_s15, [#allocation7], %s4628_s16, %s4628_s16, %s3631_s26  }
  0x46   :  { %s3636_s22 = smov [#allocation11]   ;;  %s3637_s23 = smov [#allocation12]  }
  0x47   :  { %s89_s8 = sshll.u32 %s3636_s22, 4  ;;  %s103_s24 = sshll.u32 %s3637_s23, 4  ;;  %s90_s8 = int_to_ptr.vmem [resolvable:$true] %s89_s8  ;;  %s3793_s24 = int_to_ptr.vmem [resolvable:$true] %s103_s24 }
  0x48   :  { %s3552_s25 = scalar_lea.hbm %s4621_s10, 2048 }
  0x49   :  { %p3553_p4 = scmp.ne.s32.totalorder %s4621_s10, %s3552_s25  ;;  %p3556_p5 = scmp.lt.u32.totalorder %s3552_s25, %s4621_s10 }
  0x4b   :  { %p3558_p6 = pnand %p3556_p5, %p3553_p4 }
  0x4d   :  { %3561 = shalt.err (!%p3558_p6)
}
  0x4e   :  { %s3562_s7 = scalar_lea.vmem %s90_s8, 2048  ;;  %p3567_p8 = scmp.lt.s32.totalorder %s90_s8, %s90_s8 }
  0x4f   :  { %p3563_p7 = scmp.ne.s32.totalorder %s90_s8, %s3562_s7  ;;  %p3568_p9 = scmp.lt.s32.totalorder %s3562_s7, %s3562_s7 }
  0x51   :  { %p3569_p10 = por %p3568_p9, %p3567_p8 }
  0x53   :  { %p3570_p11 = pnand %p3569_p10, %p3563_p7 }
  0x55   :  { %3573 = shalt.err (!%p3570_p11)
}
  0x56   :  { %95 = dma.hbm_to_vmem [thread:$0]  %s4621_s10, 2048, %s90_s8, [#allocation10], %s3632_s5, %s3632_s5, %s3633_s30  }
  0x57   :  { %s3574_s2 = scalar_lea.hbm %s4623_s12, 2048 }
  0x58   :  { %p3575_p12 = scmp.ne.s32.totalorder %s4623_s12, %s3574_s2  ;;  %p3578_p13 = scmp.lt.u32.totalorder %s3574_s2, %s4623_s12 }
  0x5a   :  { %p3580_p0 = pnand %p3578_p13, %p3575_p12 }
  0x5c   :  { %3583 = shalt.err (!%p3580_p0)
}
  0x5d   :  { %s3584_s29 = scalar_lea.vmem %s3793_s24, 2048  ;;  %p3589_p2 = scmp.lt.s32.totalorder %s3793_s24, %s3793_s24 }
  0x5e   :  { %p3585_p1 = scmp.ne.s32.totalorder %s3793_s24, %s3584_s29  ;;  %p3590_p3 = scmp.lt.s32.totalorder %s3584_s29, %s3584_s29 }
  0x60   :  { %p3591_p4 = por %p3590_p3, %p3589_p2 }
  0x62   :  { %p3592_p5 = pnand %p3591_p4, %p3585_p1 }
  0x64   :  { %3595 = shalt.err (!%p3592_p5)
}
  0x65   :  { %109 = dma.hbm_to_vmem [thread:$0]  %s4623_s12, 2048, %s3793_s24, [#allocation13], %s3632_s5, %s3632_s5, %s3633_s30  }
  0x66   :  { %3618 = dma.done.wait [#allocation4], 1024  }
  0x67   :  { %3619 = vsyncadd [#allocation4], 4294966272 }
  0x68   :  { %3620 = dma.done.wait [#allocation7], 4096  }
  0x69   :  { %3621 = vsyncadd [#allocation7], 4294963200 }
  0x6a   :  { %3622 = dma.done.wait [#allocation10], 3072  }
  0x6b   :  { %3623 = vsyncadd [#allocation10], 4294964224 }
  0x6c   :  { %3624 = dma.done.wait [#allocation13], 2048  }
  0x6d   :  { %3625 = vsyncadd [#allocation13], 4294965248  ;;  %v3638_v0 = vmov 0   ;;  %v3639_v1 = vmov 0.0   ;;  %v134_v2 = vld [vmem:[%s4611_s0 + $0x10] sm:$0xff]  ;;  %v132_v3 = vld [vmem:[%s4611_s0] sm:$0xff]  ;;  %v130_v32 = vlaneseq }
  0x6e   :  { %3299 = vset.pattern.permute.xlu1 %v3638_v0  ;;  %3298 = vset.pattern.permute.xlu0 %v3638_v0  ;;  %v135_v4 = vld [vmem:[%s4611_s0 + $0x18] sm:$0xff]  ;;  %v133_v5 = vld [vmem:[%s4611_s0 + $0x8] sm:$0xff]  ;;  %v180_v6 = vld [vmem:[%s4612_s1] sm:$0xff]  ;;  %vm212_vm0 = vcmask 1041408   ;;  %vm187_vm1 = vcmask 408576   ;;  %vm341_vm10 = vcmask 261120  }
  0x6f   :  { %430 = vmatprep.mubr.f32.mxu1 %v3639_v1  ;;  %147 = vperm.xlu1 %3299, %v134_v2   ;;  %v181_v7 = vld [vmem:[%s4612_s1 + $0x8] sm:$0xff]  ;;  %v182_v8 = vld [vmem:[%s4612_s1 + $0x10] sm:$0xff]  ;;  %v183_v9 = vld [vmem:[%s4612_s1 + $0x18] sm:$0xff]  ;;  %v3877_v33 = vand.u32 127, %v130_v32  ;;  %vm607_vm13 = vcmask 523520   ;;  %vm502_vm14 = vcmask 523264  }
  0x70   :  { %141 = vperm.xlu0 %3298, %v132_v3   ;;  %v2930_v10 = vpack.c.bf16 %v181_v7, %v180_v6  ;;  %v2934_v11 = vpack.c.bf16 %v183_v9, %v182_v8  ;;  %v184_v12 = vld [vmem:[%s4612_s1 + $0x20] sm:$0xff]  ;;  %v185_v13 = vld [vmem:[%s4612_s1 + $0x28] sm:$0xff]  ;;  %v139_v17 = vld [vmem:[%s4611_s0 + $0x38] sm:$0xff]  ;;  %vm3642_vm15 = vmmov 0  }
  0x71   :  { %v137_v14 = vld [vmem:[%s4611_s0 + $0x28] sm:$0xff]  ;;  %v136_v15 = vld [vmem:[%s4611_s0 + $0x20] sm:$0xff]  ;;  %v2938_v16 = vpack.c.bf16 %v185_v13, %v184_v12  ;;  %v138_v18 = vld [vmem:[%s4611_s0 + $0x30] sm:$0xff] }
  0x72   :  { %2931 = vmatprep.subr.bf16.mxu0 %v2930_v10  ;;  %v186_v19 = vld [vmem:[%s4612_s1 + $0x30] sm:$0x3]  ;;  %v322_v20 = vld [vmem:[#allocation3 + $0x8] sm:$0xff]  ;;  %v324_v21 = vld [vmem:[#allocation3 + $0x18] sm:$0xff] }
  0x73   :  { %150 = vperm.xlu1 %3299, %v135_v4   ;;  %2933 = vmatpush3.bf16.msra.mxu0 %v2930_v10  ;;  %v321_v22 = vld [vmem:[#allocation3] sm:$0xff]  ;;  %v2942_v23 = vpack.c.bf16 %v324_v21, %v322_v20  ;;  %v323_v24 = vld [vmem:[#allocation3 + $0x10] sm:$0xff]  ;;  %v326_v25 = vld [vmem:[#allocation3 + $0x28] sm:$0xff]  ;;  %v4013_v21 = vshrl.u32 %v130_v32, 7 }
  0x74   :  { %144 = vperm.xlu0 %3298, %v133_v5   ;;  %2935 = vmatprep.subr.bf16.mxu0 %v2934_v11  ;;  %v328_v26 = vld [vmem:[#allocation3 + $0x38] sm:$0xff]  ;;  %v2944_v27 = vpack.c.bf16 %v323_v24, %v321_v22  ;;  %v325_v29 = vld [vmem:[#allocation3 + $0x20] sm:$0xff]  ;;  %v327_v30 = vld [vmem:[#allocation3 + $0x30] sm:$0xff] }
  0x75   :  { %v2946_v28 = vpack.c.bf16 %v328_v26, %v326_v25  ;;  %2943 = vmatprep.subr.bf16.mxu1 %v2942_v23  ;;  %v2948_v31 = vpack.c.bf16 %v327_v30, %v325_v29  ;;  %v485_v50 = vld [vmem:[%s4615_s4 + $0x8] sm:$0xff]  ;;  %v487_v51 = vld [vmem:[%s4615_s4 + $0x18] sm:$0xff]  ;;  %v484_v53 = vld [vmem:[%s4615_s4] sm:$0xff]  ;;  %v333_v22 = vsub.s32 0, %v4013_v21  ;;  %v337_v25 = vsub.s32 1, %v4013_v21 }
  0x76   :  { %2945 = vmatpush1.bf16.msra.mxu1 %v2944_v27  ;;  %v3910_v52 = vpack.c.bf16 %v487_v51, %v485_v50  ;;  %v486_v54 = vld [vmem:[%s4615_s4 + $0x10] sm:$0xff]  ;;  %v489_v56 = vld [vmem:[%s4615_s4 + $0x28] sm:$0xff]  ;;  %v491_v57 = vld [vmem:[%s4615_s4 + $0x38] sm:$0xff] }
  0x77   :  { %156 = vperm.xlu1 %3299, %v137_v14   ;;  %2937 = vmatpush3.bf16.msra.mxu0 %v2934_v11  ;;  %v3918_v55 = vpack.c.bf16 %v486_v54, %v484_v53  ;;  %v3929_v58 = vpack.c.bf16 %v491_v57, %v489_v56  ;;  %v488_v59 = vld [vmem:[%s4615_s4 + $0x20] sm:$0xff]  ;;  %v490_v60 = vld [vmem:[%s4615_s4 + $0x30] sm:$0xff]  ;;  %v493_v62 = vld [vmem:[%s4615_s4 + $0x48] sm:$0xff] }
  0x78   :  { %153 = vperm.xlu0 %3298, %v136_v15   ;;  %2939 = vmatprep.subr.bf16.mxu0 %v2938_v16  ;;  %v3937_v61 = vpack.c.bf16 %v490_v60, %v488_v59  ;;  %v495_v63 = vld [vmem:[%s4615_s4 + $0x58] sm:$0xff]  ;;  %v492_v2 = vld [vmem:[%s4615_s4 + $0x40] sm:$0xff]  ;;  %v494_v3 = vld [vmem:[%s4615_s4 + $0x50] sm:$0xff] }
  0x79   :  { %2947 = vmatprep.subr.bf16.mxu1 %v2946_v28  ;;  %v3947_v0 = vpack.c.bf16 %v495_v63, %v493_v62  ;;  %v3955_v4 = vpack.c.bf16 %v494_v3, %v492_v2  ;;  %v497_v5 = vld [vmem:[%s4615_s4 + $0x68] sm:$0xff]  ;;  %v499_v6 = vld [vmem:[%s4615_s4 + $0x78] sm:$0xff]  ;;  %v496_v8 = vld [vmem:[%s4615_s4 + $0x60] sm:$0xff] }
  0x7a   :  { %2949 = vmatpush1.bf16.msra.mxu1 %v2948_v31  ;;  %v3965_v7 = vpack.c.bf16 %v499_v6, %v497_v5  ;;  %v498_v9 = vld [vmem:[%s4615_s4 + $0x70] sm:$0xff]  ;;  %v329_v23 = vld [vmem:[%s4614_s3] sm:$0x3]  ;;  %s3640_s3 = smov 64  }
  0x7b   :  { %162 = vperm.xlu1 %3299, %v139_v17   ;;  %2941 = vmatpush3.bf16.msra.mxu0 %v2938_v16  ;;  %v3973_v10 = vpack.c.bf16 %v498_v9, %v496_v8  ;;  %v334_v27 = vrot.slane %v329_v23, %v333_v22  ;;  %v338_v28 = vrot.slane %v329_v23, %v337_v25 }
  0x7c   :  { %159 = vperm.xlu0 %3298, %v138_v18   ;;  %2827 = vmatprep.subr.msk.mxu0 %vm212_vm0, %v186_v19 }
  0x7d   :  { %2967 = vmatprep.subr.bf16.mxu1 %v3910_v52 }
  0x7f   :  { %2828 = vmatpush3.msk.msra.mxu0 %vm212_vm0, %v186_v19 }
  0x80   :  { %2951 = vmatprep.subr.bf16.mxu0 %v3910_v52 }
  0xee   :  { %v148_v34 = vpop.permute.xlu1 %147 }
  0xef   :  { %v142_v35 = vpop.permute.xlu0 %141  ;;  %vm166_vm3 = vcmp.eq.s32.totalorder %v148_v34, %v3877_v33 }
  0xf0   :  { %vm164_vm2 = vcmp.eq.s32.totalorder %v142_v35, %v3877_v33  ;;  %v174_v39 = vsel %vm166_vm3, 1.0, %v3639_v1 }
  0xf1   :  { %v172_v36 = vsel %vm164_vm2, 1.0, %v3639_v1 }
  0xf2   :  { %2829 = vmatprep.mubr.msk.f32.mxu0 %vm187_vm1, %v172_v36  ;;  %v151_v37 = vpop.permute.xlu1 %150 }
  0xf3   :  { %v145_v38 = vpop.permute.xlu0 %144  ;;  %vm167_vm4 = vcmp.eq.s32.totalorder %v151_v37, %v3877_v33  ;;  %v479_v37 = vadd.s32 128, %v3877_v33 }
  0xf4   :  { %vm165_vm5 = vcmp.eq.s32.totalorder %v145_v38, %v3877_v33  ;;  %v175_v41 = vsel %vm167_vm4, 1.0, %v3639_v1 }
  0xf5   :  { %v173_v40 = vsel %vm165_vm5, 1.0, %v3639_v1 }
  0xf6   :  { %2830 = vmatmul.mubr.msk.f32.vlgmr.msra.gmra.mrb[0].mxu0 %vm187_vm1, %v173_v40  ;;  %v157_v42 = vpop.permute.xlu1 %156  ;;  %v480_v40 = vand.u32 63, %v3877_v33 }
  0xf7   :  { %v154_v43 = vpop.permute.xlu0 %153  ;;  %2832 = vmatprep.mubr.msk.f32.mxu0 %vm187_vm1, %v174_v39  ;;  %vm169_vm7 = vcmp.eq.s32.totalorder %v157_v42, %v3877_v33  ;;  %2953 = vmatpush1.bf16.msra.mxu0 %v3918_v55 }
  0xf8   :  { %vm168_vm6 = vcmp.eq.s32.totalorder %v154_v43, %v3877_v33  ;;  %v177_v47 = vsel %vm169_vm7, 1.0, %v3639_v1  ;;  %2955 = vmatprep.subr.bf16.mxu0 %v3929_v58  ;;  %v481_v43 = vand.u32 63, %v479_v37  ;;  %vm4038_vm11 = vcmp.lt.s32.totalorder %v480_v40, 32 }
  0xf9   :  { %v176_v44 = vsel %vm168_vm6, 1.0, %v3639_v1 }
  0xfa   :  { %2833 = vmatmul.mubr.msk.f32.gmra.mrb[2].mxu0 %vm187_vm1, %v175_v41  ;;  %v163_v45 = vpop.permute.xlu1 %162  ;;  %vm4044_vm12 = vcmp.lt.s32.totalorder %v481_v43, 32 }
  0xfb   :  { %2835 = vmatprep.mubr.msk.f32.mxu0 %vm187_vm1, %v176_v44  ;;  %v160_v46 = vpop.permute.xlu0 %159  ;;  %vm171_vm9 = vcmp.eq.s32.totalorder %v163_v45, %v3877_v33  ;;  %2957 = vmatpush1.bf16.msra.mxu0 %v3937_v61 }
  0xfc   :  { %vm170_vm8 = vcmp.eq.s32.totalorder %v160_v46, %v3877_v33  ;;  %v179_v49 = vsel %vm171_vm9, 1.0, %v3639_v1  ;;  %2959 = vmatprep.subr.bf16.mxu0 %v3947_v0 }
  0xfd   :  { %v178_v48 = vsel %vm170_vm8, 1.0, %v3639_v1 }
  0xfe   :  { %2836 = vmatmul.mubr.msk.f32.gmra.mrb[4].mxu0 %vm187_vm1, %v177_v47 }
  0xff   :  { %2838 = vmatprep.mubr.msk.f32.mxu0 %vm187_vm1, %v178_v48  ;;  %2961 = vmatpush1.bf16.msra.mxu0 %v3955_v4 }
 0x100   :  { %2963 = vmatprep.subr.bf16.mxu0 %v3965_v7 }
 0x102   :  { %2839 = vmatmul.mubr.msk.f32.gmra.mrb[6].mxu0 %vm187_vm1, %v179_v49  ;;  %v2359_v49 = vld [vmem:[#allocation9] sm:$0xff] }
 0x103   :  { %570 = vmatprep.mubr.f32.mxu0 %v3639_v1  ;;  %2965 = vmatpush1.bf16.msra.mxu0 %v3973_v10 }
 0x104   :  { %2983 = vmatprep.subr.bf16.mxu0 %v3910_v52 }
 0x106   :  { %571 = vmatmul.mubr.f32.vlgmr.msra.gmra.mrb[8].mxu0 %v3639_v1 }
 0x107   :  { %2985 = vmatpush1.bf16.msra.mxu0 %v3918_v55  ;;  %783 = vmatprep.mubr.f32.mxu0 %v3639_v1 }
 0x108   :  { %2987 = vmatprep.subr.bf16.mxu0 %v3929_v58 }
 0x10b   :  { %2989 = vmatpush1.bf16.msra.mxu0 %v3937_v61 }
 0x10c   :  { %2991 = vmatprep.subr.bf16.mxu0 %v3947_v0 }
 0x10f   :  { %2993 = vmatpush1.bf16.msra.mxu0 %v3955_v4 }
 0x110   :  { %2995 = vmatprep.subr.bf16.mxu0 %v3965_v7 }
 0x113   :  { %2997 = vmatpush1.bf16.msra.mxu0 %v3973_v10 }
 0x114   :  { %3015 = vmatprep.subr.bf16.mxu0 %v3910_v52 }
 0x1c9   :  { %v2831_v11 = vpop.f32.mrb[0].mxu0 }
 0x1ca   :  { %v282_v12 = vpop.f32.mrb[1].mxu0 }
 0x1cb   :  { %2675 = vmatmul.mubr.msk.f32.vlgmr.msra.gmra.mrb[0].mxu1 %vm341_vm10, %v282_v12 }
 0x1cc   :  { %436 = vmatprep.mubr.f32.mxu1 %v3639_v1  ;;  %2969 = vmatpush1.bf16.msra.mxu1 %v3918_v55 }
 0x1cd   :  { %v2834_v13 = vpop.f32.mrb[2].mxu0  ;;  %2971 = vmatprep.subr.bf16.mxu1 %v3929_v58 }
 0x1ce   :  { %v292_v14 = vpop.f32.mrb[3].mxu0 }
 0x1cf   :  { %2676 = vmatmul.mubr.msk.f32.gmra.mrb[2].mxu1 %vm341_vm10, %v2831_v11 }
 0x1d0   :  { %442 = vmatprep.mubr.f32.mxu1 %v3639_v1  ;;  %2973 = vmatpush1.bf16.msra.mxu1 %v3937_v61 }
 0x1d1   :  { %v2837_v15 = vpop.f32.mrb[4].mxu0  ;;  %2975 = vmatprep.subr.bf16.mxu1 %v3947_v0 }
 0x1d2   :  { %v302_v16 = vpop.f32.mrb[5].mxu0 }
 0x1d3   :  { %2677 = vmatmul.mubr.msk.f32.gmra.mrb[4].mxu1 %vm341_vm10, %v292_v14 }
 0x1d4   :  { %448 = vmatprep.mubr.f32.mxu1 %v3639_v1  ;;  %2977 = vmatpush1.bf16.msra.mxu1 %v3955_v4 }
 0x1d5   :  { %v2840_v17 = vpop.f32.mrb[6].mxu0  ;;  %2979 = vmatprep.subr.bf16.mxu1 %v3965_v7 }
 0x1d6   :  { %v312_v18 = vpop.f32.mrb[7].mxu0 }
 0x1d7   :  { %2678 = vmatmul.mubr.msk.f32.gmra.mrb[6].mxu1 %vm341_vm10, %v2834_v13 }
 0x1d8   :  { %454 = vmatprep.mubr.f32.mxu1 %v3639_v1  ;;  %2981 = vmatpush1.bf16.msra.mxu1 %v3973_v10 }
 0x1d9   :  { %2999 = vmatprep.subr.bf16.mxu1 %v3910_v52  ;;  %v572_v19 = vpop.f32.mrb[8].mxu0 }
 0x1da   :  { %v574_v20 = vpop.f32.mrb[9].mxu0 }
 0x1db   :  { %2679 = vmatmul.mubr.msk.f32.gmra.mrb[8].mxu1 %vm341_vm10, %v302_v16 }
 0x1dc   :  { %460 = vmatprep.mubr.f32.mxu1 %v3639_v1 }
 0x1df   :  { %2680 = vmatmul.mubr.msk.f32.gmra.mrb[10].mxu1 %vm341_vm10, %v2837_v15 }
 0x1e0   :  { %466 = vmatprep.mubr.f32.mxu1 %v3639_v1 }
 0x1e3   :  { %2681 = vmatmul.mubr.msk.f32.gmra.mrb[12].mxu1 %vm341_vm10, %v312_v18 }
 0x1e4   :  { %472 = vmatprep.mubr.f32.mxu1 %v3639_v1 }
 0x1e7   :  { %2682 = vmatmul.mubr.msk.f32.gmra.mrb[14].mxu1 %vm341_vm10, %v2840_v17 }
 0x1e8   :  { %677 = vmatprep.mubr.f32.mxu1 %v3639_v1 }
 0x29e   :  { %v432_v24 = vpop.f32.mrb[0].mxu1 }
 0x29f   :  { %v434_v26 = vpop.f32.mrb[1].mxu1  ;;  %v4106_v16 = vadd.f32 %v432_v24, %v334_v27 }
 0x2a0   :  { %v4110_v23 = vadd.f32 %v434_v26, %v338_v28 }
 0x2a2   :  { %v438_v29 = vpop.f32.mrb[2].mxu1 }
 0x2a3   :  { %v4024_v30 = vadd.f32 %v438_v29, %v334_v27  ;;  %v440_v31 = vpop.f32.mrb[3].mxu1 }
 0x2a4   :  { %v4026_v32 = vadd.f32 %v440_v31, %v338_v28 }
 0x2a6   :  { %v444_v34 = vpop.f32.mrb[4].mxu1 }
 0x2a7   :  { %v4028_v35 = vadd.f32 %v444_v34, %v334_v27  ;;  %v446_v36 = vpop.f32.mrb[5].mxu1 }
 0x2a8   :  { %v4031_v38 = vadd.f32 %v446_v36, %v338_v28 }
 0x2aa   :  { %v450_v39 = vpop.f32.mrb[6].mxu1 }
 0x2ab   :  { %v4034_v41 = vadd.f32 %v450_v39, %v334_v27  ;;  %v452_v42 = vpop.f32.mrb[7].mxu1 }
 0x2ac   :  { %v4036_v44 = vadd.f32 %v452_v42, %v338_v28 }
 0x2ae   :  { %v456_v45 = vpop.f32.mrb[8].mxu1 }
 0x2af   :  { %v4042_v47 = vadd.f32 %v456_v45, %v334_v27  ;;  %v458_v48 = vpop.f32.mrb[9].mxu1 }
 0x2b0   :  { %v4048_v50 = vadd.f32 %v458_v48, %v338_v28 }
 0x2b1   :  { %v821_v33 = vsel %vm4038_vm11, %v4034_v41, %v4042_v47  ;;  %v927_v51 = vsel %vm4038_vm11, %v4042_v47, %v4034_v41 }
 0x2b2   :  { %v462_v53 = vpop.f32.mrb[10].mxu1  ;;  %v822_v54 = vsel %vm4044_vm12, %v4036_v44, %v4048_v50  ;;  %v928_v56 = vsel %vm4044_vm12, %v4048_v50, %v4036_v44 }
 0x2b3   :  { %v4066_v57 = vadd.f32 %v462_v53, %v334_v27  ;;  %v464_v59 = vpop.f32.mrb[11].mxu1 }
 0x2b4   :  { %v4068_v60 = vadd.f32 %v464_v59, %v338_v28 }
 0x2b5   :  { %v715_v62 = vsel %vm4038_vm11, %v4028_v35, %v4066_v57  ;;  %v1033_v63 = vsel %vm4038_vm11, %v4066_v57, %v4028_v35 }
 0x2b6   :  { %v468_v2 = vpop.f32.mrb[12].mxu1  ;;  %v716_v3 = vsel %vm4044_vm12, %v4031_v38, %v4068_v60  ;;  %v1034_v5 = vsel %vm4044_vm12, %v4068_v60, %v4031_v38 }
 0x2b7   :  { %v4086_v6 = vadd.f32 %v468_v2, %v334_v27  ;;  %v470_v8 = vpop.f32.mrb[13].mxu1 }
 0x2b8   :  { %v4088_v9 = vadd.f32 %v470_v8, %v338_v28 }
 0x2b9   :  { %v609_v11 = vsel %vm4038_vm11, %v4024_v30, %v4086_v6  ;;  %v1139_v12 = vsel %vm4038_vm11, %v4086_v6, %v4024_v30 }
 0x2ba   :  { %v474_v13 = vpop.f32.mrb[14].mxu1  ;;  %v610_v14 = vsel %vm4044_vm12, %v4026_v32, %v4088_v9  ;;  %v1140_v15 = vsel %vm4044_vm12, %v4088_v9, %v4026_v32 }
 0x2bb   :  { %v4108_v17 = vadd.f32 %v474_v13, %v334_v27  ;;  %v476_v18 = vpop.f32.mrb[15].mxu1 }
 0x2bc   :  { %v4112_v29 = vadd.f32 %v476_v18, %v338_v28 }
 0x2bd   :  { %v500_v31 = vsel %vm4038_vm11, %v4106_v16, %v4108_v17  ;;  %v1245_v34 = vsel %vm4038_vm11, %v4108_v17, %v4106_v16 }
 0x2be   :  { %v577_v36 = vadd.f32 %v572_v19, %v500_v31  ;;  %v501_v24 = vsel %vm4044_vm12, %v4110_v23, %v4112_v29  ;;  %v1246_v26 = vsel %vm4044_vm12, %v4112_v29, %v4110_v23  ;;  %v1362_v23 = vld [vmem:[#allocation6 + $0x18] sm:$0xff]  ;;  %v1359_v29 = vld [vmem:[#allocation6] sm:$0xff] }
 0x2bf   :  { %v578_v27 = vadd.f32 %v574_v20, %v501_v24 }
 0x2c0   :  { %v2683_v28 = vmul.f32 -1.442695, %v577_v36 }
 0x2c1   :  { %v2684_v37 = vmul.f32 -1.442695, %v578_v27 }
 0x2c2   :  { %3300 = vpow2.f32 %v2683_v28 }
 0x2c3   :  { %3302 = vpow2.f32 %v2684_v37 }
 0x2cc   :  { %v3301_v39 = vpop.eup %3300 }
 0x2cd   :  { %v3303_v40 = vpop.eup %3302  ;;  %v585_v43 = vadd.f32 1.0, %v3301_v39 }
 0x2ce   :  { %v586_v42 = vadd.f32 1.0, %v3303_v40 }
 0x2d0   :  { %3304 = vrcp.f32 %v586_v42 }
 0x2d1   :  { %3306 = vrcp.f32 %v585_v43 }
 0x2da   :  { %v3305_v19 = vpop.eup %3304 }
 0x2db   :  { %v591_v45 = vmul.f32 2.0, %v3305_v19  ;;  %v3307_v53 = vpop.eup %3306 }
 0x2dc   :  { %v593_v2 = vmul.f32 0.0, %v3307_v53 }
 0x2dd   :  { %v2685_v48 = vadd.f32 -1.0, %v591_v45 }
 0x2df   :  { %v594_v59 = vmul.f32 %v3307_v53, %v2685_v48 }
 0x2e1   :  { %596 = vrot.lane.b32.xlu0 %v594_v59, %s3640_s3 }
 0x353   :  { %v597_v20 = vpop.permute.xlu0 %596 }
 0x354   :  { %v599_v8 = vadd.f32 %v597_v20, %v593_v2 }
 0x356   :  { %3308 = vtanh.f32 %v599_v8 }
 0x360   :  { %v3309_v13 = vpop.eup %3308 }
 0x361   :  { %v601_v18 = vmul.f32 %v3309_v13, %v3305_v19 }
 0x363   :  { %603 = vrot.lane.b32.xlu1 %v601_v18, %s3640_s3 }
 0x3d5   :  { %v604_v31 = vpop.permute.xlu1 %603 }
 0x3d6   :  { %606 = vst.msk [vmem:[#allocation2] sm:$0xff] %vm341_vm10, %v604_v31  ;;  %2686 = vmatmul.mubr.msk.f32.vlgmr.msra.gmra.mrb[16].mxu1 %vm502_vm14, %v604_v31 }
 0x3d7   :  { %608 = vst.msk [vmem:[#allocation2 + $0x38] sm:$0xff] %vm607_vm13, %v604_v31  ;;  %3001 = vmatpush1.bf16.msra.mxu1 %v3918_v55  ;;  %889 = vmatprep.mubr.f32.mxu1 %v3639_v1 }
 0x3d8   :  { %3003 = vmatprep.subr.bf16.mxu1 %v3929_v58 }
 0x3db   :  { %3005 = vmatpush1.bf16.msra.mxu1 %v3937_v61 }
 0x3dc   :  { %3007 = vmatprep.subr.bf16.mxu1 %v3947_v0 }
 0x3df   :  { %3009 = vmatpush1.bf16.msra.mxu1 %v3955_v4 }
 0x3e0   :  { %3011 = vmatprep.subr.bf16.mxu1 %v3965_v7 }
 0x3e3   :  { %3013 = vmatpush1.bf16.msra.mxu1 %v3973_v10 }
 0x3e4   :  { %3031 = vmatprep.subr.bf16.mxu1 %v3910_v52 }
 0x4a9   :  { %v679_v36 = vpop.f32.mrb[16].mxu1 }
 0x4aa   :  { %v684_v24 = vadd.f32 %v679_v36, %v609_v11  ;;  %v681_v27 = vpop.f32.mrb[17].mxu1 }
 0x4ab   :  { %v685_v28 = vadd.f32 %v681_v27, %v610_v14 }
 0x4ac   :  { %v2687_v37 = vmul.f32 -1.442695, %v684_v24 }
 0x4ad   :  { %v2688_v39 = vmul.f32 -1.442695, %v685_v28 }
 0x4ae   :  { %3310 = vpow2.f32 %v2687_v37 }
 0x4af   :  { %3312 = vpow2.f32 %v2688_v39 }
 0x4b8   :  { %v3311_v40 = vpop.eup %3310 }
 0x4b9   :  { %v3313_v42 = vpop.eup %3312  ;;  %v692_v19 = vadd.f32 1.0, %v3311_v40 }
 0x4ba   :  { %v693_v43 = vadd.f32 1.0, %v3313_v42 }
 0x4bc   :  { %3314 = vrcp.f32 %v693_v43 }
 0x4bd   :  { %3316 = vrcp.f32 %v692_v19 }
 0x4c6   :  { %v3315_v45 = vpop.eup %3314 }
 0x4c7   :  { %v698_v48 = vmul.f32 2.0, %v3315_v45  ;;  %v3317_v59 = vpop.eup %3316 }
 0x4c8   :  { %v700_v11 = vmul.f32 %v3317_v59, %v599_v8 }
 0x4c9   :  { %v2689_v53 = vadd.f32 -1.0, %v698_v48 }
 0x4cb   :  { %v701_v2 = vmul.f32 %v3317_v59, %v2689_v53 }
 0x4cd   :  { %703 = vrot.lane.b32.xlu0 %v701_v2, %s3640_s3 }
 0x53f   :  { %v704_v20 = vpop.permute.xlu0 %703 }
 0x540   :  { %v706_v14 = vadd.f32 %v704_v20, %v700_v11 }
 0x542   :  { %3318 = vtanh.f32 %v706_v14 }
 0x54c   :  { %v3319_v13 = vpop.eup %3318 }
 0x54d   :  { %v708_v18 = vmul.f32 %v3319_v13, %v3315_v45 }
 0x54f   :  { %710 = vrot.lane.b32.xlu1 %v708_v18, %s3640_s3 }
 0x5c1   :  { %v711_v31 = vpop.permute.xlu1 %710 }
 0x5c2   :  { %713 = vst.msk [vmem:[#allocation2 + $0x8] sm:$0xff] %vm341_vm10, %v711_v31  ;;  %2690 = vmatmul.mubr.msk.f32.vlgmr.msra.gmra.mrb[10].mxu0 %vm502_vm14, %v711_v31 }
 0x5c3   :  { %714 = vst.msk [vmem:[#allocation2 + $0x30] sm:$0xff] %vm607_vm13, %v711_v31  ;;  %3017 = vmatpush1.bf16.msra.mxu0 %v3918_v55  ;;  %995 = vmatprep.mubr.f32.mxu0 %v3639_v1 }
 0x5c4   :  { %3019 = vmatprep.subr.bf16.mxu0 %v3929_v58 }
 0x5c7   :  { %3021 = vmatpush1.bf16.msra.mxu0 %v3937_v61 }
 0x5c8   :  { %3023 = vmatprep.subr.bf16.mxu0 %v3947_v0 }
 0x5cb   :  { %3025 = vmatpush1.bf16.msra.mxu0 %v3955_v4 }
 0x5cc   :  { %3027 = vmatprep.subr.bf16.mxu0 %v3965_v7 }
 0x5cf   :  { %3029 = vmatpush1.bf16.msra.mxu0 %v3973_v10 }
 0x5d0   :  { %3047 = vmatprep.subr.bf16.mxu0 %v3910_v52 }
 0x695   :  { %v785_v8 = vpop.f32.mrb[10].mxu0 }
 0x696   :  { %v790_v36 = vadd.f32 %v785_v8, %v715_v62  ;;  %v787_v24 = vpop.f32.mrb[11].mxu0 }
 0x697   :  { %v791_v27 = vadd.f32 %v787_v24, %v716_v3 }
 0x698   :  { %v2691_v28 = vmul.f32 -1.442695, %v790_v36 }
 0x699   :  { %v2692_v37 = vmul.f32 -1.442695, %v791_v27 }
 0x69a   :  { %3320 = vpow2.f32 %v2691_v28 }
 0x69b   :  { %3322 = vpow2.f32 %v2692_v37 }
 0x6a4   :  { %v3321_v39 = vpop.eup %3320 }
 0x6a5   :  { %v3323_v40 = vpop.eup %3322  ;;  %v798_v43 = vadd.f32 1.0, %v3321_v39 }
 0x6a6   :  { %v799_v42 = vadd.f32 1.0, %v3323_v40 }
 0x6a8   :  { %3324 = vrcp.f32 %v799_v42 }
 0x6a9   :  { %3326 = vrcp.f32 %v798_v43 }
 0x6b2   :  { %v3325_v19 = vpop.eup %3324 }
 0x6b3   :  { %v804_v45 = vmul.f32 2.0, %v3325_v19  ;;  %v3327_v48 = vpop.eup %3326 }
 0x6b4   :  { %v806_v59 = vmul.f32 %v3327_v48, %v706_v14 }
 0x6b5   :  { %v2693_v62 = vadd.f32 -1.0, %v804_v45 }
 0x6b7   :  { %v807_v53 = vmul.f32 %v3327_v48, %v2693_v62 }
 0x6b9   :  { %809 = vrot.lane.b32.xlu0 %v807_v53, %s3640_s3 }
 0x72b   :  { %v810_v2 = vpop.permute.xlu0 %809 }
 0x72c   :  { %v812_v3 = vadd.f32 %v810_v2, %v806_v59 }
 0x72e   :  { %3328 = vtanh.f32 %v812_v3 }
 0x738   :  { %v3329_v11 = vpop.eup %3328 }
 0x739   :  { %v814_v20 = vmul.f32 %v3329_v11, %v3325_v19 }
 0x73b   :  { %816 = vrot.lane.b32.xlu1 %v814_v20, %s3640_s3 }
 0x7ad   :  { %v817_v13 = vpop.permute.xlu1 %816 }
 0x7ae   :  { %819 = vst.msk [vmem:[#allocation2 + $0x10] sm:$0xff] %vm341_vm10, %v817_v13  ;;  %2694 = vmatmul.mubr.msk.f32.vlgmr.msra.gmra.mrb[18].mxu1 %vm502_vm14, %v817_v13 }
 0x7af   :  { %820 = vst.msk [vmem:[#allocation2 + $0x28] sm:$0xff] %vm607_vm13, %v817_v13  ;;  %3033 = vmatpush1.bf16.msra.mxu1 %v3918_v55  ;;  %1101 = vmatprep.mubr.f32.mxu1 %v3639_v1 }
 0x7b0   :  { %3035 = vmatprep.subr.bf16.mxu1 %v3929_v58 }
 0x7b3   :  { %3037 = vmatpush1.bf16.msra.mxu1 %v3937_v61 }
 0x7b4   :  { %3039 = vmatprep.subr.bf16.mxu1 %v3947_v0 }
 0x7b7   :  { %3041 = vmatpush1.bf16.msra.mxu1 %v3955_v4 }
 0x7b8   :  { %3043 = vmatprep.subr.bf16.mxu1 %v3965_v7 }
 0x7bb   :  { %3045 = vmatpush1.bf16.msra.mxu1 %v3973_v10 }
 0x7bc   :  { %3063 = vmatprep.subr.bf16.mxu1 %v3910_v52 }
 0x881   :  { %v891_v14 = vpop.f32.mrb[18].mxu1 }
 0x882   :  { %v896_v18 = vadd.f32 %v891_v14, %v821_v33  ;;  %v893_v31 = vpop.f32.mrb[19].mxu1 }
 0x883   :  { %v897_v8 = vadd.f32 %v893_v31, %v822_v54 }
 0x884   :  { %v2695_v36 = vmul.f32 -1.442695, %v896_v18 }
 0x885   :  { %v2696_v24 = vmul.f32 -1.442695, %v897_v8 }
 0x886   :  { %3330 = vpow2.f32 %v2695_v36 }
 0x887   :  { %3332 = vpow2.f32 %v2696_v24 }
 0x890   :  { %v3331_v27 = vpop.eup %3330 }
 0x891   :  { %v3333_v52 = vpop.eup %3332  ;;  %v904_v37 = vadd.f32 1.0, %v3331_v27 }
 0x892   :  { %v905_v28 = vadd.f32 1.0, %v3333_v52 }
 0x894   :  { %3334 = vrcp.f32 %v905_v28 }
 0x895   :  { %3336 = vrcp.f32 %v904_v37 }
 0x89e   :  { %v3335_v39 = vpop.eup %3334 }
 0x89f   :  { %v910_v40 = vmul.f32 2.0, %v3335_v39  ;;  %v3337_v42 = vpop.eup %3336 }
 0x8a0   :  { %v912_v19 = vmul.f32 %v3337_v42, %v812_v3 }
 0x8a1   :  { %v2697_v33 = vadd.f32 -1.0, %v910_v40 }
 0x8a3   :  { %v913_v43 = vmul.f32 %v3337_v42, %v2697_v33 }
 0x8a5   :  { %915 = vrot.lane.b32.xlu0 %v913_v43, %s3640_s3 }
 0x917   :  { %v916_v45 = vpop.permute.xlu0 %915 }
 0x918   :  { %v918_v54 = vadd.f32 %v916_v45, %v912_v19 }
 0x91a   :  { %3338 = vtanh.f32 %v918_v54 }
 0x924   :  { %v3339_v62 = vpop.eup %3338 }
 0x925   :  { %v920_v48 = vmul.f32 %v3339_v62, %v3335_v39 }
 0x927   :  { %922 = vrot.lane.b32.xlu1 %v920_v48, %s3640_s3 }
 0x999   :  { %v923_v53 = vpop.permute.xlu1 %922 }
 0x99a   :  { %925 = vst.msk [vmem:[#allocation2 + $0x18] sm:$0xff] %vm341_vm10, %v923_v53  ;;  %2698 = vmatmul.mubr.msk.f32.vlgmr.msra.gmra.mrb[12].mxu0 %vm502_vm14, %v923_v53 }
 0x99b   :  { %926 = vst.msk [vmem:[#allocation2 + $0x20] sm:$0xff] %vm607_vm13, %v923_v53  ;;  %3049 = vmatpush1.bf16.msra.mxu0 %v3918_v55  ;;  %1207 = vmatprep.mubr.f32.mxu0 %v3639_v1 }
 0x99c   :  { %3051 = vmatprep.subr.bf16.mxu0 %v3929_v58 }
 0x99f   :  { %3053 = vmatpush1.bf16.msra.mxu0 %v3937_v61 }
 0x9a0   :  { %3055 = vmatprep.subr.bf16.mxu0 %v3947_v0 }
 0x9a3   :  { %3057 = vmatpush1.bf16.msra.mxu0 %v3955_v4 }
 0x9a4   :  { %3059 = vmatprep.subr.bf16.mxu0 %v3965_v7 }
 0x9a7   :  { %3061 = vmatpush1.bf16.msra.mxu0 %v3973_v10 }
 0xa6d   :  { %v997_v59 = vpop.f32.mrb[12].mxu0 }
 0xa6e   :  { %v1002_v2 = vadd.f32 %v997_v59, %v927_v51  ;;  %v999_v3 = vpop.f32.mrb[13].mxu0 }
 0xa6f   :  { %v1003_v11 = vadd.f32 %v999_v3, %v928_v56 }
 0xa70   :  { %v2699_v20 = vmul.f32 -1.442695, %v1002_v2 }
 0xa71   :  { %v2700_v13 = vmul.f32 -1.442695, %v1003_v11 }
 0xa72   :  { %3340 = vpow2.f32 %v2699_v20 }
 0xa73   :  { %3342 = vpow2.f32 %v2700_v13 }
 0xa7c   :  { %v3341_v14 = vpop.eup %3340 }
 0xa7d   :  { %v3343_v18 = vpop.eup %3342  ;;  %v1010_v8 = vadd.f32 1.0, %v3341_v14 }
 0xa7e   :  { %v1011_v31 = vadd.f32 1.0, %v3343_v18 }
 0xa80   :  { %3344 = vrcp.f32 %v1011_v31 }
 0xa81   :  { %3346 = vrcp.f32 %v1010_v8 }
 0xa8a   :  { %v3345_v36 = vpop.eup %3344 }
 0xa8b   :  { %v1016_v41 = vmul.f32 2.0, %v3345_v36  ;;  %v3347_v51 = vpop.eup %3346 }
 0xa8c   :  { %v1018_v27 = vmul.f32 %v3347_v51, %v918_v54 }
 0xa8d   :  { %v2701_v47 = vadd.f32 -1.0, %v1016_v41 }
 0xa8f   :  { %v1019_v24 = vmul.f32 %v3347_v51, %v2701_v47 }
 0xa91   :  { %1021 = vrot.lane.b32.xlu0 %v1019_v24, %s3640_s3 }
 0xb03   :  { %v1022_v44 = vpop.permute.xlu0 %1021 }
 0xb04   :  { %v1024_v50 = vadd.f32 %v1022_v44, %v1018_v27 }
 0xb06   :  { %3348 = vtanh.f32 %v1024_v50 }
 0xb10   :  { %v3349_v56 = vpop.eup %3348 }
 0xb11   :  { %v1026_v52 = vmul.f32 %v3349_v56, %v3345_v36 }
 0xb13   :  { %1028 = vrot.lane.b32.xlu1 %v1026_v52, %s3640_s3 }
 0xb85   :  { %v1029_v28 = vpop.permute.xlu1 %1028 }
 0xb86   :  { %1031 = vst.msk [vmem:[#allocation2 + $0x20] sm:$0xff] %vm341_vm10, %v1029_v28  ;;  %2702 = vmatmul.mubr.msk.f32.vlgmr.msra.gmra.mrb[20].mxu1 %vm502_vm14, %v1029_v28 }
 0xb87   :  { %1032 = vst.msk [vmem:[#allocation2 + $0x18] sm:$0xff] %vm607_vm13, %v1029_v28  ;;  %3065 = vmatpush1.bf16.msra.mxu1 %v3918_v55  ;;  %1313 = vmatprep.mubr.f32.mxu1 %v3639_v1 }
 0xb88   :  { %3067 = vmatprep.subr.bf16.mxu1 %v3929_v58 }
 0xb8b   :  { %3069 = vmatpush1.bf16.msra.mxu1 %v3937_v61 }
 0xb8c   :  { %3071 = vmatprep.subr.bf16.mxu1 %v3947_v0 }
 0xb8f   :  { %3073 = vmatpush1.bf16.msra.mxu1 %v3955_v4 }
 0xb90   :  { %3075 = vmatprep.subr.bf16.mxu1 %v3965_v7 }
 0xb93   :  { %3077 = vmatpush1.bf16.msra.mxu1 %v3973_v10 }
 0xc59   :  { %v1103_v37 = vpop.f32.mrb[20].mxu1 }
 0xc5a   :  { %v1108_v55 = vadd.f32 %v1103_v37, %v1033_v63  ;;  %v1105_v39 = vpop.f32.mrb[21].mxu1 }
 0xc5b   :  { %v1109_v58 = vadd.f32 %v1105_v39, %v1034_v5  ;;  %v1360_v39 = vld [vmem:[#allocation6 + $0x8] sm:$0xff] }
 0xc5c   :  { %v2703_v61 = vmul.f32 -1.442695, %v1108_v55 }
 0xc5d   :  { %v2704_v0 = vmul.f32 -1.442695, %v1109_v58  ;;  %v1361_v58 = vld [vmem:[#allocation6 + $0x10] sm:$0xff] }
 0xc5e   :  { %3350 = vpow2.f32 %v2703_v61  ;;  %v1364_v61 = vld [vmem:[#allocation6 + $0x28] sm:$0xff] }
 0xc5f   :  { %3352 = vpow2.f32 %v2704_v0  ;;  %v1366_v0 = vld [vmem:[#allocation6 + $0x38] sm:$0xff] }
 0xc68   :  { %v3351_v4 = vpop.eup %3350 }
 0xc69   :  { %v3353_v7 = vpop.eup %3352  ;;  %v1116_v40 = vadd.f32 1.0, %v3351_v4  ;;  %v3080_v4 = vpack.c.bf16 %v1361_v58, %v1359_v29 }
 0xc6a   :  { %v1117_v10 = vadd.f32 1.0, %v3353_v7  ;;  %v3082_v7 = vpack.c.bf16 %v1366_v0, %v1364_v61  ;;  %v1375_v0 = vld [vmem:[%s4617_s6] sm:$0x3] }
 0xc6c   :  { %3354 = vrcp.f32 %v1117_v10  ;;  %v1363_v10 = vld [vmem:[#allocation6 + $0x20] sm:$0xff] }
 0xc6d   :  { %3356 = vrcp.f32 %v1116_v40  ;;  %v1365_v40 = vld [vmem:[#allocation6 + $0x30] sm:$0xff] }
 0xc76   :  { %v3355_v33 = vpop.eup %3354 }
 0xc77   :  { %v1122_v35 = vmul.f32 2.0, %v3355_v33  ;;  %v3357_v63 = vpop.eup %3356 }
 0xc78   :  { %v1124_v43 = vmul.f32 %v3357_v63, %v1024_v50 }
 0xc79   :  { %v2705_v57 = vadd.f32 -1.0, %v1122_v35 }
 0xc7b   :  { %v1125_v42 = vmul.f32 %v3357_v63, %v2705_v57  ;;  %v1368_v63 = vld [vmem:[#allocation6 + $0x48] sm:$0xff] }
 0xc7d   :  { %1127 = vrot.lane.b32.xlu0 %v1125_v42, %s3640_s3  ;;  %v1370_v42 = vld [vmem:[#allocation6 + $0x58] sm:$0xff] }
 0xcef   :  { %v1128_v38 = vpop.permute.xlu0 %1127 }
 0xcf0   :  { %v1130_v60 = vadd.f32 %v1128_v38, %v1124_v43  ;;  %v3086_v38 = vpack.c.bf16 %v1370_v42, %v1368_v63 }
 0xcf2   :  { %3358 = vtanh.f32 %v1130_v60 }
 0xcfc   :  { %v3359_v5 = vpop.eup %3358 }
 0xcfd   :  { %v1132_v19 = vmul.f32 %v3359_v5, %v3355_v33  ;;  %v3084_v33 = vpack.c.bf16 %v1365_v40, %v1363_v10  ;;  %v1369_v5 = vld [vmem:[#allocation6 + $0x50] sm:$0xff]  ;;  %v1380_v10 = vrot.slane %v1375_v0, %v333_v22  ;;  %v1384_v40 = vrot.slane %v1375_v0, %v337_v25 }
 0xcff   :  { %1134 = vrot.lane.b32.xlu1 %v1132_v19, %s3640_s3 }
 0xd71   :  { %v1135_v45 = vpop.permute.xlu1 %1134 }
 0xd72   :  { %1137 = vst.msk [vmem:[#allocation2 + $0x28] sm:$0xff] %vm341_vm10, %v1135_v45  ;;  %2706 = vmatmul.mubr.msk.f32.vlgmr.msra.gmra.mrb[14].mxu0 %vm502_vm14, %v1135_v45 }
 0xd73   :  { %1138 = vst.msk [vmem:[#allocation2 + $0x10] sm:$0xff] %vm607_vm13, %v1135_v45  ;;  %1475 = vmatprep.mubr.f32.mxu0 %v3639_v1  ;;  %v1372_v45 = vld [vmem:[#allocation6 + $0x68] sm:$0xff] }
 0xe45   :  { %v1209_v54 = vpop.f32.mrb[14].mxu0 }
 0xe46   :  { %v1214_v62 = vadd.f32 %v1209_v54, %v1139_v12  ;;  %v1211_v48 = vpop.f32.mrb[15].mxu0  ;;  %v1374_v54 = vld [vmem:[#allocation6 + $0x78] sm:$0xff] }
 0xe47   :  { %v1215_v53 = vadd.f32 %v1211_v48, %v1140_v15  ;;  %v3090_v48 = vpack.c.bf16 %v1374_v54, %v1372_v45 }
 0xe48   :  { %v2707_v59 = vmul.f32 -1.442695, %v1214_v62  ;;  %v1371_v62 = vld [vmem:[#allocation6 + $0x60] sm:$0xff] }
 0xe49   :  { %v2708_v2 = vmul.f32 -1.442695, %v1215_v53  ;;  %v1373_v53 = vld [vmem:[#allocation6 + $0x70] sm:$0xff] }
 0xe4a   :  { %3360 = vpow2.f32 %v2707_v59  ;;  %v3092_v59 = vpack.c.bf16 %v1373_v53, %v1371_v62 }
 0xe4b   :  { %3362 = vpow2.f32 %v2708_v2 }
 0xe54   :  { %v3361_v3 = vpop.eup %3360 }
 0xe55   :  { %v3363_v11 = vpop.eup %3362  ;;  %v1222_v13 = vadd.f32 1.0, %v3361_v3 }
 0xe56   :  { %v1223_v20 = vadd.f32 1.0, %v3363_v11  ;;  %v1525_v11 = vld [vmem:[#allocation8 + $0x8] sm:$0xff] }
 0xe58   :  { %3364 = vrcp.f32 %v1223_v20  ;;  %v1527_v20 = vld [vmem:[#allocation8 + $0x18] sm:$0xff] }
 0xe59   :  { %3366 = vrcp.f32 %v1222_v13  ;;  %v4272_v13 = vpack.c.bf16 %v1527_v20, %v1525_v11 }
 0xe5b   :  { %3095 = vmatprep.subr.bf16.mxu1 %v4272_v13 }
 0xe62   :  { %v3365_v14 = vpop.eup %3364 }
 0xe63   :  { %v1228_v30 = vmul.f32 2.0, %v3365_v14  ;;  %v3367_v12 = vpop.eup %3366 }
 0xe64   :  { %v1230_v31 = vmul.f32 %v3367_v12, %v1130_v60  ;;  %v1367_v60 = vld [vmem:[#allocation6 + $0x40] sm:$0xff] }
 0xe65   :  { %v2709_v6 = vadd.f32 -1.0, %v1228_v30  ;;  %v3088_v19 = vpack.c.bf16 %v1369_v5, %v1367_v60  ;;  %v1526_v30 = vld [vmem:[#allocation8 + $0x10] sm:$0xff] }
 0xe67   :  { %v1231_v18 = vmul.f32 %v3367_v12, %v2709_v6  ;;  %v1529_v12 = vld [vmem:[#allocation8 + $0x28] sm:$0xff] }
 0xe69   :  { %1233 = vrot.lane.b32.xlu0 %v1231_v18, %s3640_s3  ;;  %v1531_v18 = vld [vmem:[#allocation8 + $0x38] sm:$0xff] }
 0xedb   :  { %v1234_v32 = vpop.permute.xlu0 %1233 }
 0xedc   :  { %v1236_v9 = vadd.f32 %v1234_v32, %v1230_v31  ;;  %v4279_v31 = vpack.c.bf16 %v1531_v18, %v1529_v12  ;;  %v1528_v32 = vld [vmem:[#allocation8 + $0x20] sm:$0xff] }
 0xede   :  { %3368 = vtanh.f32 %v1236_v9 }
 0xee8   :  { %v3369_v15 = vpop.eup %3368 }
 0xee9   :  { %v1238_v8 = vmul.f32 %v3369_v15, %v3365_v14  ;;  %v1524_v14 = vld [vmem:[#allocation8] sm:$0xff] }
 0xeea   :  { %v4274_v6 = vpack.c.bf16 %v1526_v30, %v1524_v14 }
 0xeeb   :  { %1240 = vrot.lane.b32.xlu1 %v1238_v8, %s3640_s3  ;;  %v1533_v8 = vld [vmem:[#allocation8 + $0x48] sm:$0xff] }
 0xf5d   :  { %v1241_v36 = vpop.permute.xlu1 %1240 }
 0xf5e   :  { %1243 = vst.msk [vmem:[#allocation2 + $0x30] sm:$0xff] %vm341_vm10, %v1241_v36  ;;  %2710 = vmatmul.mubr.msk.f32.vlgmr.msra.gmra.mrb[22].mxu1 %vm502_vm14, %v1241_v36 }
 0xf5f   :  { %1244 = vst.msk [vmem:[#allocation2 + $0x8] sm:$0xff] %vm607_vm13, %v1241_v36  ;;  %1606 = vmatprep.mubr.f32.mxu1 %v3639_v1  ;;  %3097 = vmatpush1.bf16.msra.mxu1 %v4274_v6  ;;  %v1535_v36 = vld [vmem:[#allocation8 + $0x58] sm:$0xff] }
 0xf60   :  { %3099 = vmatprep.subr.bf16.mxu1 %v4279_v31 }
 0xf65   :  { %v1357_v29 = vld [vmem:[#allocation2 + $0x30] sm:$0xff] }
0x1031   :  { %v1315_v41 = vpop.f32.mrb[22].mxu1 }
0x1032   :  { %v1320_v47 = vadd.f32 %v1315_v41, %v1245_v34  ;;  %v1317_v51 = vpop.f32.mrb[23].mxu1  ;;  %v4285_v41 = vpack.c.bf16 %v1535_v36, %v1533_v8 }
0x1033   :  { %v1321_v24 = vadd.f32 %v1317_v51, %v1246_v26  ;;  %v3078_v26 = vpack.c.bf16 %v1362_v23, %v1360_v39  ;;  %v1534_v51 = vld [vmem:[#allocation8 + $0x50] sm:$0xff]  ;;  %v1355_v39 = vld [vmem:[#allocation2 + $0x20] sm:$0xff]  ;;  %v1356_v23 = vld [vmem:[#allocation2 + $0x28] sm:$0xff] }
0x1034   :  { %v2711_v27 = vmul.f32 -1.442695, %v1320_v47  ;;  %v1532_v47 = vld [vmem:[#allocation8 + $0x40] sm:$0xff] }
0x1035   :  { %v2712_v44 = vmul.f32 -1.442695, %v1321_v24  ;;  %3079 = vmatprep.subr.bf16.mxu0 %v3078_v26  ;;  %v4287_v24 = vpack.c.bf16 %v1534_v51, %v1532_v47 }
0x1036   :  { %3370 = vpow2.f32 %v2711_v27  ;;  %3081 = vmatpush1.bf16.msra.mxu0 %v3080_v4  ;;  %v1537_v27 = vld [vmem:[#allocation8 + $0x68] sm:$0xff] }
0x1037   :  { %3372 = vpow2.f32 %v2712_v44  ;;  %3083 = vmatprep.subr.bf16.mxu0 %v3082_v7  ;;  %v1539_v44 = vld [vmem:[#allocation8 + $0x78] sm:$0xff] }
0x103a   :  { %3085 = vmatpush1.bf16.msra.mxu0 %v3084_v33 }
0x103b   :  { %3087 = vmatprep.subr.bf16.mxu0 %v3086_v38 }
0x103e   :  { %3089 = vmatpush1.bf16.msra.mxu0 %v3088_v19 }
0x103f   :  { %3091 = vmatprep.subr.bf16.mxu0 %v3090_v48 }
0x1040   :  { %v3371_v50 = vpop.eup %3370 }
0x1041   :  { %v3373_v56 = vpop.eup %3372  ;;  %v1328_v28 = vadd.f32 1.0, %v3371_v50  ;;  %v4291_v50 = vpack.c.bf16 %v1539_v44, %v1537_v27 }
0x1042   :  { %v1329_v52 = vadd.f32 1.0, %v3373_v56  ;;  %3093 = vmatpush1.bf16.msra.mxu0 %v3092_v59  ;;  %v1536_v56 = vld [vmem:[#allocation8 + $0x60] sm:$0xff] }
0x1043   :  { %3127 = vmatprep.subr.bf16.mxu0 %v4272_v13 }
0x1044   :  { %3374 = vrcp.f32 %v1329_v52  ;;  %v1538_v52 = vld [vmem:[#allocation8 + $0x70] sm:$0xff] }
0x1045   :  { %3376 = vrcp.f32 %v1328_v28  ;;  %v4293_v28 = vpack.c.bf16 %v1538_v52, %v1536_v56 }
0x104e   :  { %v3375_v37 = vpop.eup %3374 }
0x104f   :  { %v1334_v16 = vmul.f32 2.0, %v3375_v37  ;;  %v3377_v34 = vpop.eup %3376 }
0x1050   :  { %v1336_v35 = vmul.f32 %v3377_v34, %v1236_v9  ;;  %v1530_v9 = vld [vmem:[#allocation8 + $0x30] sm:$0xff] }
0x1051   :  { %v2713_v17 = vadd.f32 -1.0, %v1334_v16  ;;  %v4281_v15 = vpack.c.bf16 %v1530_v9, %v1528_v32 }
0x1053   :  { %v1337_v55 = vmul.f32 %v3377_v34, %v2713_v17  ;;  %3101 = vmatpush1.bf16.msra.mxu1 %v4281_v15  ;;  %v1352_v17 = vld [vmem:[#allocation2 + $0x8] sm:$0xff]  ;;  %v1353_v34 = vld [vmem:[#allocation2 + $0x10] sm:$0xff] }
0x1054   :  { %3103 = vmatprep.subr.bf16.mxu1 %v4285_v41 }
0x1055   :  { %1339 = vrot.lane.b32.xlu0 %v1337_v55, %s3640_s3  ;;  %v1354_v55 = vld [vmem:[#allocation2 + $0x18] sm:$0xff] }
0x1057   :  { %3105 = vmatpush1.bf16.msra.mxu1 %v4287_v24 }
0x1058   :  { %3107 = vmatprep.subr.bf16.mxu1 %v4291_v50 }
0x105b   :  { %3109 = vmatpush1.bf16.msra.mxu1 %v4293_v28 }
0x105c   :  { %3111 = vmatprep.subr.bf16.mxu1 %v4272_v13 }
0x105e   :  { %1607 = vmatmul.mubr.f32.vlgmr.msra.gmra.mrb[24].mxu1 %v3639_v1 }
0x105f   :  { %3113 = vmatpush1.bf16.msra.mxu1 %v4274_v6  ;;  %1709 = vmatprep.mubr.f32.mxu1 %v3639_v1 }
0x1060   :  { %3115 = vmatprep.subr.bf16.mxu1 %v4279_v31 }
0x1063   :  { %3117 = vmatpush1.bf16.msra.mxu1 %v4281_v15 }
0x1064   :  { %3119 = vmatprep.subr.bf16.mxu1 %v4285_v41 }
0x1067   :  { %3121 = vmatpush1.bf16.msra.mxu1 %v4287_v24 }
0x1068   :  { %3123 = vmatprep.subr.bf16.mxu1 %v4291_v50 }
0x106b   :  { %3125 = vmatpush1.bf16.msra.mxu1 %v4293_v28 }
0x106c   :  { %3143 = vmatprep.subr.bf16.mxu1 %v4272_v13 }
0x10c7   :  { %v1340_v57 = vpop.permute.xlu0 %1339 }
0x10c8   :  { %v1342_v43 = vadd.f32 %v1340_v57, %v1336_v35 }
0x10ca   :  { %3378 = vtanh.f32 %v1342_v43 }
0x10d4   :  { %v3379_v2 = vpop.eup %3378 }
0x10d5   :  { %v1344_v3 = vmul.f32 %v3379_v2, %v3375_v37 }
0x10d7   :  { %1346 = vrot.lane.b32.xlu1 %v1344_v3, %s3640_s3 }
0x1131   :  { %v1608_v58 = vpop.f32.mrb[24].mxu1 }
0x1132   :  { %v1610_v61 = vpop.f32.mrb[25].mxu1 }
0x1149   :  { %v1347_v37 = vpop.permute.xlu1 %1346 }
0x114a   :  { %1349 = vst.msk [vmem:[#allocation2 + $0x38] sm:$0xff] %vm341_vm10, %v1347_v37 }
0x114b   :  { %1350 = vst.msk [vmem:[#allocation2] sm:$0xff] %vm607_vm13, %v1347_v37 }
0x1151   :  { %v1358_v26 = vld [vmem:[#allocation2 + $0x38] sm:$0xff] }
0x1152   :  { %v1351_v16 = vld [vmem:[#allocation2] sm:$0xff] }
0x1153   :  { %2714 = vmatmul.mubr.msk.f32.vlgmr.msra.gmra.mrb[16].mxu0 %vm502_vm14, %v1351_v16 }
0x1154   :  { %1481 = vmatprep.mubr.f32.mxu0 %v3639_v1  ;;  %3129 = vmatpush1.bf16.msra.mxu0 %v4274_v6 }
0x1155   :  { %3131 = vmatprep.subr.bf16.mxu0 %v4279_v31 }
0x1157   :  { %2715 = vmatmul.mubr.msk.f32.gmra.mrb[18].mxu0 %vm502_vm14, %v1352_v17 }
0x1158   :  { %1487 = vmatprep.mubr.f32.mxu0 %v3639_v1  ;;  %3133 = vmatpush1.bf16.msra.mxu0 %v4281_v15 }
0x1159   :  { %3135 = vmatprep.subr.bf16.mxu0 %v4285_v41 }
0x115b   :  { %2716 = vmatmul.mubr.msk.f32.gmra.mrb[20].mxu0 %vm502_vm14, %v1353_v34 }
0x115c   :  { %1493 = vmatprep.mubr.f32.mxu0 %v3639_v1  ;;  %3137 = vmatpush1.bf16.msra.mxu0 %v4287_v24 }
0x115d   :  { %3139 = vmatprep.subr.bf16.mxu0 %v4291_v50 }
0x115f   :  { %2717 = vmatmul.mubr.msk.f32.gmra.mrb[22].mxu0 %vm502_vm14, %v1354_v55 }
0x1160   :  { %1499 = vmatprep.mubr.f32.mxu0 %v3639_v1  ;;  %3141 = vmatpush1.bf16.msra.mxu0 %v4293_v28 }
0x1161   :  { %3159 = vmatprep.subr.bf16.mxu0 %v4272_v13 }
0x1163   :  { %2718 = vmatmul.mubr.msk.f32.gmra.mrb[24].mxu0 %vm502_vm14, %v1355_v39 }
0x1164   :  { %1505 = vmatprep.mubr.f32.mxu0 %v3639_v1 }
0x1167   :  { %2719 = vmatmul.mubr.msk.f32.gmra.mrb[26].mxu0 %vm502_vm14, %v1356_v23 }
0x1168   :  { %1511 = vmatprep.mubr.f32.mxu0 %v3639_v1 }
0x116b   :  { %2720 = vmatmul.mubr.msk.f32.gmra.mrb[28].mxu0 %vm502_vm14, %v1357_v29 }
0x116c   :  { %1517 = vmatprep.mubr.f32.mxu0 %v3639_v1 }
0x116f   :  { %2721 = vmatmul.mubr.msk.f32.gmra.mrb[30].mxu0 %vm502_vm14, %v1358_v26 }
0x1170   :  { %1812 = vmatprep.mubr.f32.mxu0 %v3639_v1 }
0x1226   :  { %v1477_v4 = vpop.f32.mrb[16].mxu0 }
0x1227   :  { %v1479_v7 = vpop.f32.mrb[17].mxu0  ;;  %v4413_v37 = vadd.f32 %v1477_v4, %v1380_v10 }
0x1228   :  { %v4417_v34 = vadd.f32 %v1479_v7, %v1384_v40 }
0x122a   :  { %v1483_v33 = vpop.f32.mrb[18].mxu0 }
0x122b   :  { %v4341_v35 = vadd.f32 %v1483_v33, %v1380_v10  ;;  %v1485_v57 = vpop.f32.mrb[19].mxu0 }
0x122c   :  { %v4343_v63 = vadd.f32 %v1485_v57, %v1384_v40 }
0x122e   :  { %v1489_v42 = vpop.f32.mrb[20].mxu0 }
0x122f   :  { %v4345_v43 = vadd.f32 %v1489_v42, %v1380_v10  ;;  %v1491_v38 = vpop.f32.mrb[21].mxu0 }
0x1230   :  { %v4347_v60 = vadd.f32 %v1491_v38, %v1384_v40 }
0x1232   :  { %v1495_v5 = vpop.f32.mrb[22].mxu0 }
0x1233   :  { %v4349_v19 = vadd.f32 %v1495_v5, %v1380_v10  ;;  %v1497_v45 = vpop.f32.mrb[23].mxu0 }
0x1234   :  { %v4351_v22 = vadd.f32 %v1497_v45, %v1384_v40 }
0x1236   :  { %v1501_v21 = vpop.f32.mrb[24].mxu0 }
0x1237   :  { %v4353_v25 = vadd.f32 %v1501_v21, %v1380_v10  ;;  %v1503_v54 = vpop.f32.mrb[25].mxu0 }
0x1238   :  { %v4355_v62 = vadd.f32 %v1503_v54, %v1384_v40 }
0x1239   :  { %v1844_v48 = vsel %vm4038_vm11, %v4349_v19, %v4353_v25  ;;  %v1947_v53 = vsel %vm4038_vm11, %v4353_v25, %v4349_v19 }
0x123a   :  { %v1507_v59 = vpop.f32.mrb[26].mxu0  ;;  %v1845_v2 = vsel %vm4044_vm12, %v4351_v22, %v4355_v62  ;;  %v1948_v3 = vsel %vm4044_vm12, %v4355_v62, %v4351_v22 }
0x123b   :  { %v4373_v11 = vadd.f32 %v1507_v59, %v1380_v10  ;;  %v1509_v20 = vpop.f32.mrb[27].mxu0 }
0x123c   :  { %v4375_v14 = vadd.f32 %v1509_v20, %v1384_v40 }
0x123d   :  { %v1741_v30 = vsel %vm4038_vm11, %v4345_v43, %v4373_v11  ;;  %v2050_v12 = vsel %vm4038_vm11, %v4373_v11, %v4345_v43 }
0x123e   :  { %v1513_v18 = vpop.f32.mrb[28].mxu0  ;;  %v1742_v32 = vsel %vm4044_vm12, %v4347_v60, %v4375_v14  ;;  %v2051_v9 = vsel %vm4044_vm12, %v4375_v14, %v4347_v60 }
0x123f   :  { %v4393_v8 = vadd.f32 %v1513_v18, %v1380_v10  ;;  %v1515_v36 = vpop.f32.mrb[29].mxu0 }
0x1240   :  { %v4395_v47 = vadd.f32 %v1515_v36, %v1384_v40 }
0x1241   :  { %v1638_v51 = vsel %vm4038_vm11, %v4341_v35, %v4393_v8  ;;  %v2153_v27 = vsel %vm4038_vm11, %v4393_v8, %v4341_v35 }
0x1242   :  { %v1519_v44 = vpop.f32.mrb[30].mxu0  ;;  %v1639_v56 = vsel %vm4044_vm12, %v4343_v63, %v4395_v47  ;;  %v2154_v52 = vsel %vm4044_vm12, %v4395_v47, %v4343_v63 }
0x1243   :  { %v4415_v16 = vadd.f32 %v1519_v44, %v1380_v10  ;;  %v1521_v17 = vpop.f32.mrb[31].mxu0 }
0x1244   :  { %v4419_v55 = vadd.f32 %v1521_v17, %v1384_v40 }
0x1245   :  { %v1540_v39 = vsel %vm4038_vm11, %v4413_v37, %v4415_v16  ;;  %v2256_v23 = vsel %vm4038_vm11, %v4415_v16, %v4413_v37 }
0x1246   :  { %v1613_v29 = vadd.f32 %v1608_v58, %v1540_v39  ;;  %v1541_v26 = vsel %vm4044_vm12, %v4417_v34, %v4419_v55  ;;  %v2257_v0 = vsel %vm4044_vm12, %v4419_v55, %v4417_v34  ;;  %v2360_v34 = vld [vmem:[#allocation9 + $0x8] sm:$0xff]  ;;  %v2361_v55 = vld [vmem:[#allocation9 + $0x10] sm:$0xff] }
0x1247   :  { %v1614_v4 = vadd.f32 %v1610_v61, %v1541_v26 }
0x1248   :  { %v2722_v7 = vmul.f32 -1.442695, %v1613_v29 }
0x1249   :  { %v2723_v10 = vmul.f32 -1.442695, %v1614_v4 }
0x124a   :  { %3380 = vpow2.f32 %v2722_v7 }
0x124b   :  { %3382 = vpow2.f32 %v2723_v10 }
0x1254   :  { %v3381_v40 = vpop.eup %3380 }
0x1255   :  { %v3383_v33 = vpop.eup %3382  ;;  %v1621_v42 = vadd.f32 1.0, %v3381_v40 }
0x1256   :  { %v1622_v57 = vadd.f32 1.0, %v3383_v33 }
0x1258   :  { %3384 = vrcp.f32 %v1622_v57 }
0x1259   :  { %3386 = vrcp.f32 %v1621_v42 }
0x1262   :  { %v3385_v58 = vpop.eup %3384 }
0x1263   :  { %v1627_v38 = vmul.f32 2.0, %v3385_v58  ;;  %v3387_v45 = vpop.eup %3386 }
0x1264   :  { %v1629_v54 = vmul.f32 0.0, %v3387_v45 }
0x1265   :  { %v2724_v5 = vadd.f32 -1.0, %v1627_v38 }
0x1267   :  { %v1630_v21 = vmul.f32 %v3387_v45, %v2724_v5 }
0x1269   :  { %1632 = vrot.lane.b32.xlu0 %v1630_v21, %s3640_s3 }
0x12db   :  { %v1633_v59 = vpop.permute.xlu0 %1632 }
0x12dc   :  { %v1635_v61 = vadd.f32 %v1633_v59, %v1629_v54 }
0x12de   :  { %3388 = vtanh.f32 %v1635_v61 }
0x12e8   :  { %v3389_v20 = vpop.eup %3388 }
0x12e9   :  { %v1637_v18 = vmul.f32 %v3389_v20, %v3385_v58 }
0x12eb   :  { %1641 = vrot.lane.b32.xlu1 %v1637_v18, %s3640_s3 }
0x135d   :  { %v1642_v36 = vpop.permute.xlu1 %1641 }
0x135e   :  { %2725 = vmatmul.mubr.msk.f32.vlgmr.msra.gmra.mrb[26].mxu1 %vm502_vm14, %v1642_v36 }
0x135f   :  { %3145 = vmatpush1.bf16.msra.mxu1 %v4274_v6  ;;  %1915 = vmatprep.mubr.f32.mxu1 %v3639_v1 }
0x1360   :  { %3147 = vmatprep.subr.bf16.mxu1 %v4279_v31 }
0x1363   :  { %3149 = vmatpush1.bf16.msra.mxu1 %v4281_v15 }
0x1364   :  { %3151 = vmatprep.subr.bf16.mxu1 %v4285_v41 }
0x1367   :  { %3153 = vmatpush1.bf16.msra.mxu1 %v4287_v24 }
0x1368   :  { %3155 = vmatprep.subr.bf16.mxu1 %v4291_v50 }
0x136b   :  { %3157 = vmatpush1.bf16.msra.mxu1 %v4293_v28 }
0x136c   :  { %3175 = vmatprep.subr.bf16.mxu1 %v4272_v13 }
0x1431   :  { %v1711_v44 = vpop.f32.mrb[26].mxu1 }
0x1432   :  { %v1716_v17 = vadd.f32 %v1711_v44, %v1638_v51  ;;  %v1713_v39 = vpop.f32.mrb[27].mxu1 }
0x1433   :  { %v1717_v29 = vadd.f32 %v1713_v39, %v1639_v56 }
0x1434   :  { %v2726_v26 = vmul.f32 -1.442695, %v1716_v17 }
0x1435   :  { %v2727_v4 = vmul.f32 -1.442695, %v1717_v29 }
0x1436   :  { %3390 = vpow2.f32 %v2726_v26 }
0x1437   :  { %3392 = vpow2.f32 %v2727_v4 }
0x1440   :  { %v3391_v7 = vpop.eup %3390 }
0x1441   :  { %v3393_v10 = vpop.eup %3392  ;;  %v1724_v33 = vadd.f32 1.0, %v3391_v7 }
0x1442   :  { %v1725_v40 = vadd.f32 1.0, %v3393_v10 }
0x1444   :  { %3394 = vrcp.f32 %v1725_v40 }
0x1445   :  { %3396 = vrcp.f32 %v1724_v33 }
0x144e   :  { %v3395_v57 = vpop.eup %3394 }
0x144f   :  { %v1730_v42 = vmul.f32 2.0, %v3395_v57  ;;  %v3397_v38 = vpop.eup %3396 }
0x1450   :  { %v1732_v51 = vmul.f32 %v3397_v38, %v1635_v61 }
0x1451   :  { %v2728_v58 = vadd.f32 -1.0, %v1730_v42 }
0x1453   :  { %v1733_v5 = vmul.f32 %v3397_v38, %v2728_v58 }
0x1455   :  { %1735 = vrot.lane.b32.xlu0 %v1733_v5, %s3640_s3 }
0x14c7   :  { %v1736_v45 = vpop.permute.xlu0 %1735 }
0x14c8   :  { %v1738_v56 = vadd.f32 %v1736_v45, %v1732_v51 }
0x14ca   :  { %3398 = vtanh.f32 %v1738_v56 }
0x14d4   :  { %v3399_v21 = vpop.eup %3398 }
0x14d5   :  { %v1740_v54 = vmul.f32 %v3399_v21, %v3395_v57 }
0x14d7   :  { %1744 = vrot.lane.b32.xlu1 %v1740_v54, %s3640_s3 }
0x1549   :  { %v1745_v59 = vpop.permute.xlu1 %1744 }
0x154a   :  { %2729 = vmatmul.mubr.msk.f32.vlgmr.msra.gmra.mrb[32].mxu0 %vm502_vm14, %v1745_v59 }
0x154b   :  { %3161 = vmatpush1.bf16.msra.mxu0 %v4274_v6  ;;  %2018 = vmatprep.mubr.f32.mxu0 %v3639_v1 }
0x154c   :  { %3163 = vmatprep.subr.bf16.mxu0 %v4279_v31 }
0x154f   :  { %3165 = vmatpush1.bf16.msra.mxu0 %v4281_v15 }
0x1550   :  { %3167 = vmatprep.subr.bf16.mxu0 %v4285_v41 }
0x1553   :  { %3169 = vmatpush1.bf16.msra.mxu0 %v4287_v24 }
0x1554   :  { %3171 = vmatprep.subr.bf16.mxu0 %v4291_v50 }
0x1557   :  { %3173 = vmatpush1.bf16.msra.mxu0 %v4293_v28 }
0x1558   :  { %3191 = vmatprep.subr.bf16.mxu0 %v4272_v13 }
0x161d   :  { %v1814_v61 = vpop.f32.mrb[32].mxu0 }
0x161e   :  { %v1819_v20 = vadd.f32 %v1814_v61, %v1741_v30  ;;  %v1816_v18 = vpop.f32.mrb[33].mxu0 }
0x161f   :  { %v1820_v36 = vadd.f32 %v1816_v18, %v1742_v32 }
0x1620   :  { %v2730_v44 = vmul.f32 -1.442695, %v1819_v20 }
0x1621   :  { %v2731_v17 = vmul.f32 -1.442695, %v1820_v36 }
0x1622   :  { %3400 = vpow2.f32 %v2730_v44 }
0x1623   :  { %3402 = vpow2.f32 %v2731_v17 }
0x162c   :  { %v3401_v39 = vpop.eup %3400 }
0x162d   :  { %v3403_v29 = vpop.eup %3402  ;;  %v1827_v4 = vadd.f32 1.0, %v3401_v39 }
0x162e   :  { %v1828_v26 = vadd.f32 1.0, %v3403_v29 }
0x1630   :  { %3404 = vrcp.f32 %v1828_v26 }
0x1631   :  { %3406 = vrcp.f32 %v1827_v4 }
0x163a   :  { %v3405_v7 = vpop.eup %3404 }
0x163b   :  { %v1833_v10 = vmul.f32 2.0, %v3405_v7  ;;  %v3407_v40 = vpop.eup %3406 }
0x163c   :  { %v1835_v57 = vmul.f32 %v3407_v40, %v1738_v56 }
0x163d   :  { %v2732_v30 = vadd.f32 -1.0, %v1833_v10 }
0x163f   :  { %v1836_v33 = vmul.f32 %v3407_v40, %v2732_v30 }
0x1641   :  { %1838 = vrot.lane.b32.xlu0 %v1836_v33, %s3640_s3 }
0x16b3   :  { %v1839_v42 = vpop.permute.xlu0 %1838 }
0x16b4   :  { %v1841_v32 = vadd.f32 %v1839_v42, %v1835_v57 }
0x16b6   :  { %3408 = vtanh.f32 %v1841_v32 }
0x16c0   :  { %v3409_v58 = vpop.eup %3408 }
0x16c1   :  { %v1843_v38 = vmul.f32 %v3409_v58, %v3405_v7 }
0x16c3   :  { %1847 = vrot.lane.b32.xlu1 %v1843_v38, %s3640_s3 }
0x1735   :  { %v1848_v5 = vpop.permute.xlu1 %1847 }
0x1736   :  { %2733 = vmatmul.mubr.msk.f32.vlgmr.msra.gmra.mrb[28].mxu1 %vm502_vm14, %v1848_v5 }
0x1737   :  { %3177 = vmatpush1.bf16.msra.mxu1 %v4274_v6  ;;  %2121 = vmatprep.mubr.f32.mxu1 %v3639_v1 }
0x1738   :  { %3179 = vmatprep.subr.bf16.mxu1 %v4279_v31 }
0x173b   :  { %3181 = vmatpush1.bf16.msra.mxu1 %v4281_v15 }
0x173c   :  { %3183 = vmatprep.subr.bf16.mxu1 %v4285_v41 }
0x173f   :  { %3185 = vmatpush1.bf16.msra.mxu1 %v4287_v24 }
0x1740   :  { %3187 = vmatprep.subr.bf16.mxu1 %v4291_v50 }
0x1743   :  { %3189 = vmatpush1.bf16.msra.mxu1 %v4293_v28 }
0x1744   :  { %3207 = vmatprep.subr.bf16.mxu1 %v4272_v13 }
0x1809   :  { %v1917_v51 = vpop.f32.mrb[28].mxu1 }
0x180a   :  { %v1922_v45 = vadd.f32 %v1917_v51, %v1844_v48  ;;  %v1919_v56 = vpop.f32.mrb[29].mxu1 }
0x180b   :  { %v1923_v21 = vadd.f32 %v1919_v56, %v1845_v2 }
0x180c   :  { %v2734_v54 = vmul.f32 -1.442695, %v1922_v45 }
0x180d   :  { %v2735_v59 = vmul.f32 -1.442695, %v1923_v21 }
0x180e   :  { %3410 = vpow2.f32 %v2734_v54 }
0x180f   :  { %3412 = vpow2.f32 %v2735_v59 }
0x1818   :  { %v3411_v61 = vpop.eup %3410 }
0x1819   :  { %v3413_v13 = vpop.eup %3412  ;;  %v1930_v18 = vadd.f32 1.0, %v3411_v61 }
0x181a   :  { %v1931_v20 = vadd.f32 1.0, %v3413_v13 }
0x181c   :  { %3414 = vrcp.f32 %v1931_v20 }
0x181d   :  { %3416 = vrcp.f32 %v1930_v18 }
0x1826   :  { %v3415_v36 = vpop.eup %3414 }
0x1827   :  { %v1936_v44 = vmul.f32 2.0, %v3415_v36  ;;  %v3417_v17 = vpop.eup %3416 }
0x1828   :  { %v1938_v29 = vmul.f32 %v3417_v17, %v1841_v32 }
0x1829   :  { %v2736_v48 = vadd.f32 -1.0, %v1936_v44 }
0x182b   :  { %v1939_v39 = vmul.f32 %v3417_v17, %v2736_v48 }
0x182d   :  { %1941 = vrot.lane.b32.xlu0 %v1939_v39, %s3640_s3 }
0x189f   :  { %v1942_v26 = vpop.permute.xlu0 %1941 }
0x18a0   :  { %v1944_v2 = vadd.f32 %v1942_v26, %v1938_v29 }
0x18a2   :  { %3418 = vtanh.f32 %v1944_v2 }
0x18ac   :  { %v3419_v4 = vpop.eup %3418 }
0x18ad   :  { %v1946_v7 = vmul.f32 %v3419_v4, %v3415_v36 }
0x18af   :  { %1950 = vrot.lane.b32.xlu1 %v1946_v7, %s3640_s3 }
0x1921   :  { %v1951_v10 = vpop.permute.xlu1 %1950 }
0x1922   :  { %2737 = vmatmul.mubr.msk.f32.vlgmr.msra.gmra.mrb[34].mxu0 %vm502_vm14, %v1951_v10 }
0x1923   :  { %3193 = vmatpush1.bf16.msra.mxu0 %v4274_v6  ;;  %2224 = vmatprep.mubr.f32.mxu0 %v3639_v1 }
0x1924   :  { %3195 = vmatprep.subr.bf16.mxu0 %v4279_v31 }
0x1927   :  { %3197 = vmatpush1.bf16.msra.mxu0 %v4281_v15 }
0x1928   :  { %3199 = vmatprep.subr.bf16.mxu0 %v4285_v41 }
0x192b   :  { %3201 = vmatpush1.bf16.msra.mxu0 %v4287_v24 }
0x192c   :  { %3203 = vmatprep.subr.bf16.mxu0 %v4291_v50 }
0x192f   :  { %3205 = vmatpush1.bf16.msra.mxu0 %v4293_v28 }
0x19f5   :  { %v2020_v30 = vpop.f32.mrb[34].mxu0 }
0x19f6   :  { %v2025_v40 = vadd.f32 %v2020_v30, %v1947_v53  ;;  %v2022_v33 = vpop.f32.mrb[35].mxu0 }
0x19f7   :  { %v2026_v57 = vadd.f32 %v2022_v33, %v1948_v3 }
0x19f8   :  { %v2738_v42 = vmul.f32 -1.442695, %v2025_v40 }
0x19f9   :  { %v2739_v32 = vmul.f32 -1.442695, %v2026_v57 }
0x19fa   :  { %3420 = vpow2.f32 %v2738_v42 }
0x19fb   :  { %3422 = vpow2.f32 %v2739_v32 }
0x1a04   :  { %v3421_v58 = vpop.eup %3420 }
0x1a05   :  { %v3423_v38 = vpop.eup %3422  ;;  %v2033_v51 = vadd.f32 1.0, %v3421_v58 }
0x1a06   :  { %v2034_v5 = vadd.f32 1.0, %v3423_v38 }
0x1a08   :  { %3424 = vrcp.f32 %v2034_v5 }
0x1a09   :  { %3426 = vrcp.f32 %v2033_v51 }
0x1a12   :  { %v3425_v45 = vpop.eup %3424 }
0x1a13   :  { %v2039_v19 = vmul.f32 2.0, %v3425_v45  ;;  %v3427_v53 = vpop.eup %3426 }
0x1a14   :  { %v2041_v21 = vmul.f32 %v3427_v53, %v1944_v2 }
0x1a15   :  { %v2740_v25 = vadd.f32 -1.0, %v2039_v19 }
0x1a17   :  { %v2042_v56 = vmul.f32 %v3427_v53, %v2740_v25 }
0x1a19   :  { %2044 = vrot.lane.b32.xlu0 %v2042_v56, %s3640_s3 }
0x1a8b   :  { %v2045_v22 = vpop.permute.xlu0 %2044 }
0x1a8c   :  { %v2047_v62 = vadd.f32 %v2045_v22, %v2041_v21 }
0x1a8e   :  { %3428 = vtanh.f32 %v2047_v62 }
0x1a98   :  { %v3429_v3 = vpop.eup %3428 }
0x1a99   :  { %v2049_v54 = vmul.f32 %v3429_v3, %v3425_v45 }
0x1a9b   :  { %2053 = vrot.lane.b32.xlu1 %v2049_v54, %s3640_s3  ;;  %v3223_v54 = vpack.c.bf16 %v2360_v34, %v2359_v49  ;;  %v2753_v49 = vld [vmem:[%s4620_s9] ss:$0 sm:$0xff] }
0x1b0d   :  { %v2054_v59 = vpop.permute.xlu1 %2053 }
0x1b0e   :  { %2741 = vmatmul.mubr.msk.f32.vlgmr.msra.gmra.mrb[30].mxu1 %vm502_vm14, %v2054_v59  ;;  %v2362_v59 = vld [vmem:[#allocation9 + $0x18] sm:$0xff] }
0x1b0f   :  { %3209 = vmatpush1.bf16.msra.mxu1 %v4274_v6  ;;  %2327 = vmatprep.mubr.f32.mxu1 %v3639_v1 }
0x1b10   :  { %3211 = vmatprep.subr.bf16.mxu1 %v4279_v31 }
0x1b13   :  { %3213 = vmatpush1.bf16.msra.mxu1 %v4281_v15 }
0x1b14   :  { %3215 = vmatprep.subr.bf16.mxu1 %v4285_v41 }
0x1b17   :  { %3217 = vmatpush1.bf16.msra.mxu1 %v4287_v24 }
0x1b18   :  { %3219 = vmatprep.subr.bf16.mxu1 %v4291_v50 }
0x1b1b   :  { %3221 = vmatpush1.bf16.msra.mxu1 %v4293_v28 }
0x1be1   :  { %v2123_v61 = vpop.f32.mrb[30].mxu1 }
0x1be2   :  { %v2128_v6 = vadd.f32 %v2123_v61, %v2050_v12  ;;  %v2125_v13 = vpop.f32.mrb[31].mxu1  ;;  %v3226_v61 = vpack.c.bf16 %v2362_v59, %v2361_v55 }
0x1be3   :  { %v2129_v31 = vadd.f32 %v2125_v13, %v2051_v9  ;;  %v2364_v13 = vld [vmem:[#allocation9 + $0x28] sm:$0xff] }
0x1be4   :  { %v2742_v15 = vmul.f32 -1.442695, %v2128_v6  ;;  %v2363_v6 = vld [vmem:[#allocation9 + $0x20] sm:$0xff] }
0x1be5   :  { %v2743_v41 = vmul.f32 -1.442695, %v2129_v31  ;;  %v3229_v31 = vpack.c.bf16 %v2364_v13, %v2363_v6  ;;  %v2559_v6 = vld [vmem:[#allocation12 + $0x78] sm:$0xff] }
0x1be6   :  { %3430 = vpow2.f32 %v2742_v15  ;;  %v2365_v15 = vld [vmem:[#allocation9 + $0x30] sm:$0xff] }
0x1be7   :  { %3432 = vpow2.f32 %v2743_v41  ;;  %v2366_v41 = vld [vmem:[#allocation9 + $0x38] sm:$0xff] }
0x1bf0   :  { %v3431_v24 = vpop.eup %3430 }
0x1bf1   :  { %v3433_v50 = vpop.eup %3432  ;;  %v2136_v20 = vadd.f32 1.0, %v3431_v24  ;;  %v3232_v24 = vpack.c.bf16 %v2366_v41, %v2365_v15 }
0x1bf2   :  { %v2137_v28 = vadd.f32 1.0, %v3433_v50 }
0x1bf4   :  { %3434 = vrcp.f32 %v2137_v28 }
0x1bf5   :  { %3436 = vrcp.f32 %v2136_v20 }
0x1bfe   :  { %v3435_v18 = vpop.eup %3434 }
0x1bff   :  { %v2142_v43 = vmul.f32 2.0, %v3435_v18  ;;  %v3437_v12 = vpop.eup %3436 }
0x1c00   :  { %v2144_v44 = vmul.f32 %v3437_v12, %v2047_v62 }
0x1c01   :  { %v2744_v11 = vadd.f32 -1.0, %v2142_v43  ;;  %v2451_v43 = vld [vmem:[#allocation11 + $0x8] sm:$0xff] }
0x1c03   :  { %v2145_v36 = vmul.f32 %v3437_v12, %v2744_v11  ;;  %v2452_v11 = vld [vmem:[#allocation11 + $0x10] sm:$0xff] }
0x1c05   :  { %2147 = vrot.lane.b32.xlu0 %v2145_v36, %s3640_s3  ;;  %v2453_v36 = vld [vmem:[#allocation11 + $0x18] sm:$0xff] }
0x1c77   :  { %v2148_v60 = vpop.permute.xlu0 %2147 }
0x1c78   :  { %v2150_v14 = vadd.f32 %v2148_v60, %v2144_v44  ;;  %v3238_v44 = vpack.c.bf16 %v2453_v36, %v2452_v11  ;;  %v2454_v60 = vld [vmem:[#allocation11 + $0x20] sm:$0xff] }
0x1c7a   :  { %3438 = vtanh.f32 %v2150_v14 }
0x1c84   :  { %v3439_v9 = vpop.eup %3438 }
0x1c85   :  { %v2152_v48 = vmul.f32 %v3439_v9, %v3435_v18  ;;  %v2450_v18 = vld [vmem:[#allocation11] sm:$0xff] }
0x1c86   :  { %v3235_v12 = vpack.c.bf16 %v2451_v43, %v2450_v18 }
0x1c87   :  { %2156 = vrot.lane.b32.xlu1 %v2152_v48, %s3640_s3  ;;  %v2456_v48 = vld [vmem:[#allocation11 + $0x30] sm:$0xff] }
0x1cf9   :  { %v2157_v17 = vpop.permute.xlu1 %2156 }
0x1cfa   :  { %2745 = vmatmul.mubr.msk.f32.vlgmr.msra.gmra.mrb[36].mxu0 %vm502_vm14, %v2157_v17  ;;  %v2457_v17 = vld [vmem:[#allocation11 + $0x38] sm:$0xff] }
0x1cfb   :  { %2857 = vmatprep.mubr.msk.f32.mxu0 %vm3642_vm15, %v3639_v1 }
0x1dcd   :  { %v2226_v39 = vpop.f32.mrb[36].mxu0 }
0x1dce   :  { %v2231_v29 = vadd.f32 %v2226_v39, %v2153_v27  ;;  %v2228_v26 = vpop.f32.mrb[37].mxu0 }
0x1dcf   :  { %v2232_v2 = vadd.f32 %v2228_v26, %v2154_v52  ;;  %v3244_v26 = vpack.c.bf16 %v2457_v17, %v2456_v48 }
0x1dd0   :  { %v2746_v4 = vmul.f32 -1.442695, %v2231_v29 }
0x1dd1   :  { %v2747_v7 = vmul.f32 -1.442695, %v2232_v2  ;;  %v2458_v2 = vld [vmem:[#allocation11 + $0x40] sm:$0xff] }
0x1dd2   :  { %3440 = vpow2.f32 %v2746_v4  ;;  %v2459_v4 = vld [vmem:[#allocation11 + $0x48] sm:$0xff] }
0x1dd3   :  { %3442 = vpow2.f32 %v2747_v7  ;;  %v3247_v7 = vpack.c.bf16 %v2459_v4, %v2458_v2 }
0x1ddc   :  { %v3441_v10 = vpop.eup %3440 }
0x1ddd   :  { %v3443_v30 = vpop.eup %3442  ;;  %v2239_v33 = vadd.f32 1.0, %v3441_v10  ;;  %v2460_v10 = vld [vmem:[#allocation11 + $0x50] sm:$0xff] }
0x1dde   :  { %v2240_v40 = vadd.f32 1.0, %v3443_v30  ;;  %v2461_v30 = vld [vmem:[#allocation11 + $0x58] sm:$0xff] }
0x1de0   :  { %3444 = vrcp.f32 %v2240_v40  ;;  %v3250_v40 = vpack.c.bf16 %v2461_v30, %v2460_v10 }
0x1de1   :  { %3446 = vrcp.f32 %v2239_v33  ;;  %v2462_v33 = vld [vmem:[#allocation11 + $0x60] sm:$0xff] }
0x1dea   :  { %v3445_v57 = vpop.eup %3444 }
0x1deb   :  { %v2245_v35 = vmul.f32 2.0, %v3445_v57  ;;  %v3447_v27 = vpop.eup %3446 }
0x1dec   :  { %v2247_v32 = vmul.f32 %v3447_v27, %v2150_v14  ;;  %v2455_v14 = vld [vmem:[#allocation11 + $0x28] sm:$0xff] }
0x1ded   :  { %v2748_v8 = vadd.f32 -1.0, %v2245_v35  ;;  %v3241_v9 = vpack.c.bf16 %v2455_v14, %v2454_v60 }
0x1def   :  { %v2248_v42 = vmul.f32 %v3447_v27, %v2748_v8  ;;  %v2464_v27 = vld [vmem:[#allocation11 + $0x70] sm:$0xff] }
0x1df1   :  { %2250 = vrot.lane.b32.xlu0 %v2248_v42, %s3640_s3  ;;  %v2465_v42 = vld [vmem:[#allocation11 + $0x78] sm:$0xff] }
0x1e63   :  { %v2251_v63 = vpop.permute.xlu0 %2250 }
0x1e64   :  { %v2253_v47 = vadd.f32 %v2251_v63, %v2247_v32  ;;  %v3256_v32 = vpack.c.bf16 %v2465_v42, %v2464_v27  ;;  %v2544_v63 = vld [vmem:[#allocation12] sm:$0xff] }
0x1e66   :  { %3448 = vtanh.f32 %v2253_v47 }
0x1e70   :  { %v3449_v52 = vpop.eup %3448 }
0x1e71   :  { %v2255_v58 = vmul.f32 %v3449_v52, %v3445_v57  ;;  %v2463_v57 = vld [vmem:[#allocation11 + $0x68] sm:$0xff]  ;;  %v2546_v52 = vld [vmem:[#allocation12 + $0x10] sm:$0xff] }
0x1e72   :  { %v3253_v35 = vpack.c.bf16 %v2463_v57, %v2462_v33 }
0x1e73   :  { %2259 = vrot.lane.b32.xlu1 %v2255_v58, %s3640_s3 }
0x1ee5   :  { %v2260_v38 = vpop.permute.xlu1 %2259 }
0x1ee6   :  { %2749 = vmatmul.mubr.msk.f32.vlgmr.msra.gmra.mrb[32].mxu1 %vm502_vm14, %v2260_v38  ;;  %v2547_v38 = vld [vmem:[#allocation12 + $0x18] sm:$0xff] }
0x1ee7   :  { %2892 = vmatprep.mubr.msk.f32.mxu1 %vm3642_vm15, %v3639_v1 }
0x1fb9   :  { %v2329_v5 = vpop.f32.mrb[32].mxu1 }
0x1fba   :  { %v2334_v51 = vadd.f32 %v2329_v5, %v2256_v23  ;;  %v2331_v45 = vpop.f32.mrb[33].mxu1  ;;  %v3262_v5 = vpack.c.bf16 %v2547_v38, %v2546_v52 }
0x1fbb   :  { %v2335_v19 = vadd.f32 %v2331_v45, %v2257_v0  ;;  %v3641_v0 = vmov 0.0|0.0   ;;  %v2549_v45 = vld [vmem:[#allocation12 + $0x28] sm:$0xff] }
0x1fbc   :  { %v2750_v25 = vmul.f32 -1.442695, %v2334_v51  ;;  %3222 = vmatprep.subr.bf16.mxu0 %v3641_v0  ;;  %3234 = vmatprep.subr.bf16.mxu1 %v3641_v0  ;;  %v2548_v51 = vld [vmem:[#allocation12 + $0x20] sm:$0xff] }
0x1fbd   :  { %v2751_v53 = vmul.f32 -1.442695, %v2335_v19  ;;  %3224 = vmatpush3.bf16.msra.mxu0 %v3223_v54  ;;  %3236 = vmatpush3.bf16.msra.mxu1 %v3235_v12  ;;  %v3265_v19 = vpack.c.bf16 %v2549_v45, %v2548_v51 }
0x1fbe   :  { %3450 = vpow2.f32 %v2750_v25  ;;  %3225 = vmatprep.subr.bf16.mxu0 %v3641_v0  ;;  %3237 = vmatprep.subr.bf16.mxu1 %v3641_v0  ;;  %v2551_v25 = vld [vmem:[#allocation12 + $0x38] sm:$0xff] }
0x1fbf   :  { %3452 = vpow2.f32 %v2751_v53 }
0x1fc1   :  { %3227 = vmatpush3.bf16.msra.mxu0 %v3226_v61  ;;  %3239 = vmatpush3.bf16.msra.mxu1 %v3238_v44  ;;  %v2558_v61 = vld [vmem:[#allocation12 + $0x70] sm:$0xff] }
0x1fc2   :  { %3228 = vmatprep.subr.bf16.mxu0 %v3641_v0  ;;  %3240 = vmatprep.subr.bf16.mxu1 %v3641_v0  ;;  %v3280_v13 = vpack.c.bf16 %v2559_v6, %v2558_v61 }
0x1fc5   :  { %3230 = vmatpush3.bf16.msra.mxu0 %v3229_v31  ;;  %3242 = vmatpush3.bf16.msra.mxu1 %v3241_v9  ;;  %v2755_v31 = vld [vmem:[%s4622_s11] ss:$0 sm:$0xff]  ;;  %s3643_s11 = smov [#allocation14]  }
0x1fc6   :  { %3231 = vmatprep.subr.bf16.mxu0 %v3641_v0  ;;  %3243 = vmatprep.subr.bf16.mxu1 %v3641_v0  ;;  %s2654_s8 = sshll.u32 %s3643_s11, 4  ;;  %s2655_s8 = int_to_ptr.vmem [resolvable:$true] %s2654_s8 }
0x1fc7   :  { %p3601_p7 = scmp.lt.s32.totalorder %s2655_s8, %s2655_s8 }
0x1fc8   :  { %v3451_v56 = vpop.eup %3450 }
0x1fc9   :  { %v3453_v21 = vpop.eup %3452  ;;  %v2342_v62 = vadd.f32 1.0, %v3451_v56  ;;  %3233 = vmatpush3.bf16.msra.mxu0 %v3232_v24  ;;  %3245 = vmatpush3.bf16.msra.mxu1 %v3244_v26  ;;  %v2552_v56 = vld [vmem:[#allocation12 + $0x40] sm:$0xff] }
0x1fca   :  { %v2343_v22 = vadd.f32 1.0, %v3453_v21  ;;  %3258 = vmatprep.subr.bf16.mxu0 %v3641_v0  ;;  %3246 = vmatprep.subr.bf16.mxu1 %v3641_v0  ;;  %v2553_v21 = vld [vmem:[#allocation12 + $0x48] sm:$0xff] }
0x1fcc   :  { %3454 = vrcp.f32 %v2343_v22  ;;  %v3271_v22 = vpack.c.bf16 %v2553_v21, %v2552_v56 }
0x1fcd   :  { %3456 = vrcp.f32 %v2342_v62  ;;  %3248 = vmatpush3.bf16.msra.mxu1 %v3247_v7  ;;  %v2554_v62 = vld [vmem:[#allocation12 + $0x50] sm:$0xff] }
0x1fce   :  { %3249 = vmatprep.subr.bf16.mxu1 %v3641_v0 }
0x1fd1   :  { %3251 = vmatpush3.bf16.msra.mxu1 %v3250_v40 }
0x1fd2   :  { %3252 = vmatprep.subr.bf16.mxu1 %v3641_v0 }
0x1fd5   :  { %3254 = vmatpush3.bf16.msra.mxu1 %v3253_v35 }
0x1fd6   :  { %v3455_v46 = vpop.eup %3454  ;;  %3255 = vmatprep.subr.bf16.mxu1 %v3641_v0 }
0x1fd7   :  { %v2348_v37 = vmul.f32 2.0, %v3455_v46  ;;  %v3457_v23 = vpop.eup %3456 }
0x1fd8   :  { %v2350_v50 = vmul.f32 %v3457_v23, %v2253_v47  ;;  %v2545_v47 = vld [vmem:[#allocation12 + $0x8] sm:$0xff] }
0x1fd9   :  { %v2752_v16 = vadd.f32 -1.0, %v2348_v37  ;;  %3257 = vmatpush3.bf16.msra.mxu1 %v3256_v32  ;;  %v3259_v58 = vpack.c.bf16 %v2545_v47, %v2544_v63 }
0x1fdb   :  { %v2351_v3 = vmul.f32 %v3457_v23, %v2752_v16  ;;  %v2556_v16 = vld [vmem:[#allocation12 + $0x60] sm:$0xff]  ;;  %v2557_v23 = vld [vmem:[#allocation12 + $0x68] sm:$0xff] }
0x1fdd   :  { %2353 = vrot.lane.b32.xlu0 %v2351_v3, %s3640_s3  ;;  %v3277_v3 = vpack.c.bf16 %v2557_v23, %v2556_v16 }
0x204f   :  { %v2354_v28 = vpop.permute.xlu0 %2353 }
0x2050   :  { %v2356_v20 = vadd.f32 %v2354_v28, %v2350_v50  ;;  %v2756_v50 = vld [vmem:[%s4624_s13] ss:$0 sm:$0xff]  ;;  %s3596_s13 = scalar_lea.vmem %s2655_s8, 128 }
0x2051   :  { %p3597_p6 = scmp.ne.s32.totalorder %s2655_s8, %s3596_s13  ;;  %p3602_p8 = scmp.lt.s32.totalorder %s3596_s13, %s3596_s13 }
0x2052   :  { %3458 = vtanh.f32 %v2356_v20 }
0x2053   :  { %p3603_p9 = por %p3602_p8, %p3601_p7 }
0x2055   :  { %p3604_p10 = pnand %p3603_p9, %p3597_p6 }
0x205c   :  { %v3459_v39 = vpop.eup %3458 }
0x205d   :  { %v2358_v29 = vmul.f32 %v3459_v39, %v3455_v46  ;;  %v2555_v46 = vld [vmem:[#allocation12 + $0x58] sm:$0xff] }
0x205e   :  { %v3274_v37 = vpack.c.bf16 %v2555_v46, %v2554_v62 }
0x205f   :  { %2375 = vrot.lane.b32.xlu1 %v2358_v29, %s3640_s3 }
0x20d1   :  { %v2376_v8 = vpop.permute.xlu1 %2375 }
0x20d2   :  { %2858 = vmatmul.mubr.msk.f32.vlgmr.msra.gmra.mrb[38].mxu0 %vm502_vm14, %v2376_v8 }
0x20d3   :  { %2927 = vmatprep.mubr.msk.f32.mxu0 %vm3642_vm15, %v3639_v1  ;;  %3260 = vmatpush3.bf16.msra.mxu0 %v3259_v58  ;;  %v2550_v1 = vld [vmem:[#allocation12 + $0x30] sm:$0xff] }
0x20d4   :  { %3261 = vmatprep.subr.bf16.mxu0 %v3641_v0  ;;  %v3268_v53 = vpack.c.bf16 %v2551_v25, %v2550_v1 }
0x20d7   :  { %3263 = vmatpush3.bf16.msra.mxu0 %v3262_v5 }
0x20d8   :  { %3264 = vmatprep.subr.bf16.mxu0 %v3641_v0 }
0x20db   :  { %3266 = vmatpush3.bf16.msra.mxu0 %v3265_v19 }
0x20dc   :  { %3267 = vmatprep.subr.bf16.mxu0 %v3641_v0 }
0x20df   :  { %3269 = vmatpush3.bf16.msra.mxu0 %v3268_v53 }
0x20e0   :  { %3270 = vmatprep.subr.bf16.mxu0 %v3641_v0 }
0x20e3   :  { %3272 = vmatpush3.bf16.msra.mxu0 %v3271_v22 }
0x20e4   :  { %3273 = vmatprep.subr.bf16.mxu0 %v3641_v0 }
0x20e7   :  { %3275 = vmatpush3.bf16.msra.mxu0 %v3274_v37 }
0x20e8   :  { %3276 = vmatprep.subr.bf16.mxu0 %v3641_v0 }
0x20eb   :  { %3278 = vmatpush3.bf16.msra.mxu0 %v3277_v3 }
0x20ec   :  { %3279 = vmatprep.subr.bf16.mxu0 %v3641_v0 }
0x20ef   :  { %3281 = vmatpush3.bf16.msra.mxu0 %v3280_v13 }
0x21a5   :  { %v2445_v34 = vpop.f32.mrb[38].mxu0 }
0x21a6   :  { %v2446_v55 = vadd.f32 %v2753_v49, %v2445_v34  ;;  %v2859_v54 = vpop.f32.mrb[39].mxu0 }
0x21a8   :  { %v2449_v59 = vmax.f32 %v2446_v55, 0.0 }
0x21aa   :  { %2893 = vmatmul.mubr.f32.vlgmr.msra.gmra.mrb[34].mxu1 %v2449_v59 }
0x227d   :  { %v2539_v15 = vpop.f32.mrb[34].mxu1 }
0x227e   :  { %v2540_v41 = vadd.f32 %v2755_v31, %v2539_v15  ;;  %v2894_v0 = vpop.f32.mrb[35].mxu1 }
0x2280   :  { %v2543_v24 = vmax.f32 %v2540_v41, 0.0 }
0x2282   :  { %2928 = vmatmul.mubr.f32.vlgmr.msra.gmra.mrb[40].mxu0 %v2543_v24 }
0x2355   :  { %v2633_v28 = vpop.f32.mrb[40].mxu0 }
0x2356   :  { %v2634_v20 = vadd.f32 %v2756_v50, %v2633_v28  ;;  %v2929_v18 = vpop.f32.mrb[41].mxu0 }
0x2358   :  { %2637 = vmax.xlane.f32.xlu0 %v2634_v20 }
0x23e5   :  { %v2638_v43 = vpop.xlane.xlu0 %2637 }
0x23e6   :  { %v2639_v11 = vsub.f32 %v2634_v20, %v2638_v43 }
0x23e8   :  { %v2640_v12 = vmul.f32 1.442695, %v2639_v11 }
0x23ea   :  { %3460 = vpow2.f32 %v2640_v12 }
0x23f4   :  { %v3461_v36 = vpop.eup %3460 }
0x23f5   :  { %2642 = vadd.xlane.f32.xlu1 %v3461_v36 }
0x2482   :  { %v2643_v44 = vpop.xlane.xlu1 %2642 }
0x2483   :  { %3462 = vlog2.f32 %v2643_v44 }
0x248d   :  { %v3463_v60 = vpop.eup %3462 }
0x248e   :  { %v2645_v14 = vmul.f32 0.6931472, %v3463_v60 }
0x2490   :  { %v2646_v9 = vsub.f32 %v2639_v11, %v2645_v14 }
0x2492   :  { %2647 = vst [vmem:[#allocation14] sm:$0xff] %v2646_v9 }
0x2493   :  { %3607 = shalt.err (!%p3604_p10)
}
0x2494   :  { %s3608_s18 = scalar_lea.hbm %s4625_s14, 128 }
0x2495   :  { %p3609_p11 = scmp.ne.s32.totalorder %s4625_s14, %s3608_s18  ;;  %p3612_p12 = scmp.lt.u32.totalorder %s3608_s18, %s4625_s14 }
0x2497   :  { %p3614_p13 = pnand %p3612_p12, %p3609_p11 }
0x2499   :  { %3617 = shalt.err (!%p3614_p13)
}
0x249a   :  { %2657 = dma.vmem_to_hbm [thread:$0]  %s2655_s8, 128, %s4625_s14, [#allocation5]  }
0x249b   :  { %3626 = dma.done.wait [#allocation5], 128  }
0x249c   :  { %3627 = vsyncadd [#allocation5], 4294967168 }
0x249d   :  { %2661 = vsyncpa [#allocation4], 1 }
0x249e   :  { %2662 = vsyncpa [#allocation7], 1 }
0x249f   :  { %2663 = vsyncpa [#allocation10], 1 }
0x24a0   :  { %2664 = vsyncpa [#allocation13], 1 }
0x24a1   :  { %2665 = vsyncpa [#allocation5], 1 }

</bundles_post_ra>
